<compile_context>
chip_gen: v7x
topology: tpu7x:2x2x1
jax: 0.10.0
libtpu: 0.0.40
codegen_flags: <defaults>
</compile_context>

<pallas_src>
import functools
import numpy as np

import jax
import jax.numpy as jnp
from jax import lax
from jax.experimental import pallas as pl
from jax.experimental.pallas import tpu as pltpu


def _round_up(x, m):
    return (x + m - 1) // m * m


def _contact3d_kernel(lo_ref, hi_ref, seg_ref, ids_ref, bary_ref, out_ref,
                      vv_ref, cnt_ref, *, threshold: float, vhalf: int,
                      vt: int, n_vt: int, compute_dtype, precision):
    h = pl.program_id(0)                      # vertex half (parallel)
    c = pl.program_id(1)                      # view
    p = pl.program_id(2)                      # pixel tile
    n_views = pl.num_programs(1)
    n_ptiles = pl.num_programs(2)

    pt = seg_ref.shape[-1]

    # Fresh vertex half -> zero the across-view accumulators (out is resident).
    @pl.when(jnp.logical_and(c == 0, p == 0))
    def _():
        out_ref[...] = jnp.zeros_like(out_ref)
        cnt_ref[...] = jnp.zeros_like(cnt_ref)

    # Fresh view -> zero the per-view [votes; counts] accumulator.
    @pl.when(p == 0)
    def _():
        vv_ref[...] = jnp.zeros_like(vv_ref)

    # ---- per-pixel work: done ONCE per (view, pixel tile) -------------------
    probs = jax.nn.sigmoid(seg_ref[0].astype(jnp.float32))        # [1, Pt]
    act = probs > threshold                                       # [1, Pt]
    rows2 = lax.broadcasted_iota(jnp.int32, (2, pt), 0)
    gate = jnp.where(act, jnp.where(rows2 == 0, probs, 1.0), 0.0)  # [2, Pt]
    lhs = gate.astype(compute_dtype)                               # [2, Pt]

    ids = ids_ref[0]                                              # [Pt, 4] i32
    v0 = ids[:, 0:1]
    v1 = ids[:, 1:2]
    v2 = ids[:, 2:3]                                              # [Pt, 1]
    bar = bary_ref[0].astype(compute_dtype)                       # [Pt, 4]
    b0 = bar[:, 0:1]
    b1 = bar[:, 1:2]
    b2 = bar[:, 2:3]                                              # [Pt, 1]

    # j-independent column iota; chunk base is subtracted from the id vectors.
    col = lax.broadcasted_iota(jnp.int32, (pt, vt), 1)            # [Pt, Vt]
    zero = jnp.zeros((), compute_dtype)

    # Scalar skip hints: min/max contributing vertex id in this pixel tile.
    lo = lo_ref[c, p]
    hi = hi_ref[c, p]
    vbase0 = h * vhalf

    # ---- in-kernel loop over the vertex chunks of this half -----------------
    @pl.loop(0, n_vt)
    def _vloop(j):
        base = vbase0 + j * vt

        @pl.when(jnp.logical_and(hi >= base, lo < base + vt))
        def _():
            # Scatter-weight matrix (validity already folded into bary).
            w = (jnp.where((v0 - base) == col, b0, zero)
                 + jnp.where((v1 - base) == col, b1, zero)
                 + jnp.where((v2 - base) == col, b2, zero))       # [Pt, Vt]
            # Pixel reduction on the MXU: [2,Pt] @ [Pt,Vt] -> [votes; counts].
            res = jnp.dot(lhs, w, precision=precision,
                          preferred_element_type=jnp.float32)     # [2, Vt]
            off = pl.multiple_of(j * vt, vt)
            vv_ref[:, pl.ds(off, vt)] += res

    # ---- end of view: normalize and accumulate into the output --------------
    @pl.when(p == n_ptiles - 1)
    def _():
        votes = vv_ref[0:1, :]                                    # [1, Vhalf]
        counts = vv_ref[1:2, :]
        has = counts > 0.0
        out_ref[...] += jnp.where(has, votes / jnp.where(has, counts, 1.0), 0.0)
        cnt_ref[...] += has.astype(jnp.float32)

    # ---- end of last view: final normalization -------------------------------
    @pl.when(jnp.logical_and(c == n_views - 1, p == n_ptiles - 1))
    def _():
        cntv = cnt_ref[...]
        ok = cntv > 0.0
        out_ref[...] = jnp.where(ok, out_ref[...] / jnp.where(ok, cntv, 1.0), 0.0)


def object_mesh_contact3d_forward(seg_maps, p2v_maps, bary_maps, num_vertices,
                                  ds_names=("ocontact_demo",), threshold=0.3,
                                  block_pixels=1024, block_vertices=1024,
                                  num_vertex_splits=2,
                                  compute_dtype=jnp.bfloat16):
    """Mirrors ObjectMeshContact3DPredictor.forward (inference path).

    compute_dtype: bfloat16 on v6e/v7x (native bf16 VALU); use float32 on v5e.
    """
    if "ocontact" not in ds_names[0]:
        return jnp.zeros((1, 0), dtype=seg_maps.dtype)

    assert seg_maps.shape[0] == 1, "Batch size must be 1"
    _, C, H, W = seg_maps.shape
    P = H * W
    V = int(num_vertices)

    # Pixel tiling (lanes).
    Pt = min(_round_up(block_pixels, 128), _round_up(P, 128))
    Pp = _round_up(P, Pt)
    NP = Pp // Pt

    # Vertex tiling: nsplit halves (parallel axis), each of n_vt chunks of Vt.
    nsplit = max(1, int(num_vertex_splits))
    per_split = -(-V // nsplit)
    Vt = min(_round_up(block_vertices, 128), _round_up(per_split, 128))
    Vhalf = _round_up(per_split, Vt)
    n_vt = Vhalf // Vt
    Vp = nsplit * Vhalf

    # ---- layout / validity folding / skip hints (cheap XLA prep) -------------
    seg = seg_maps[0].reshape(C, 1, P).astype(jnp.float32)         # lane-dense
    p2v = p2v_maps.reshape(C, P, 3).astype(jnp.int32)
    bary = bary_maps.reshape(C, P, 3).astype(jnp.float32)

    valid = jnp.all((p2v >= 0) & (p2v < V), axis=-1, keepdims=True)  # [C,P,1]
    bary = jnp.where(valid, bary, 0.0)        # fold validity into the weights

    # Skip-hint tables: vertex-id range of contributing (active & valid) pixels.
    act = jax.nn.sigmoid(seg.reshape(C, P)) > threshold              # [C, P]
    contrib = act[..., None] & valid                                 # [C,P,1]
    BIG = jnp.int32(2 ** 30)
    ids_lo = jnp.where(contrib, p2v, BIG)
    ids_hi = jnp.where(contrib, p2v, -1)

    if Pp != P:
        # Large negative logits -> sigmoid ~ 0 -> inactive padded pixels.
        seg = jnp.pad(seg, ((0, 0), (0, 0), (0, Pp - P)), constant_values=-1e9)
        p2v = jnp.pad(p2v, ((0, 0), (0, Pp - P), (0, 0)))
        bary = jnp.pad(bary, ((0, 0), (0, Pp - P), (0, 0)))
        ids_lo = jnp.pad(ids_lo, ((0, 0), (0, Pp - P), (0, 0)),
                         constant_values=2 ** 30)
        ids_hi = jnp.pad(ids_hi, ((0, 0), (0, Pp - P), (0, 0)),
                         constant_values=-1)

    # 4-wide (16-byte aligned) per-pixel records, pixels on sublanes.
    ids4 = jnp.concatenate([p2v, jnp.full((C, Pp, 1), -1, jnp.int32)], axis=-1)
    bary4 = jnp.concatenate([bary, jnp.zeros((C, Pp, 1), jnp.float32)], axis=-1)

    lo_tbl = ids_lo.reshape(C, NP, Pt * 3).min(axis=-1).astype(jnp.int32)
    hi_tbl = ids_hi.reshape(C, NP, Pt * 3).max(axis=-1).astype(jnp.int32)

    precision = (lax.Precision.HIGHEST
                 if jnp.dtype(compute_dtype) == jnp.dtype(jnp.float32) else None)
    kernel = functools.partial(
        _contact3d_kernel, threshold=float(threshold), vhalf=Vhalf, vt=Vt,
        n_vt=n_vt, compute_dtype=compute_dtype, precision=precision)

    out = pl.pallas_call(
        kernel,
        out_shape=jax.ShapeDtypeStruct((1, Vp), jnp.float32),
        grid_spec=pltpu.PrefetchScalarGridSpec(
            num_scalar_prefetch=2,
            grid=(nsplit, C, NP),
            in_specs=[
                pl.BlockSpec((1, 1, Pt), lambda h, c, p, lo, hi: (c, 0, p)),
                pl.BlockSpec((1, Pt, 4), lambda h, c, p, lo, hi: (c, p, 0)),
                pl.BlockSpec((1, Pt, 4), lambda h, c, p, lo, hi: (c, p, 0)),
            ],
            out_specs=pl.BlockSpec((1, Vhalf), lambda h, c, p, lo, hi: (0, h)),
            scratch_shapes=[
                pltpu.VMEM((2, Vhalf), jnp.float32),   # per-view [votes; counts]
                pltpu.VMEM((1, Vhalf), jnp.float32),   # across-view view-count
            ],
        ),
        compiler_params=pltpu.CompilerParams(
            dimension_semantics=("parallel", "arbitrary", "arbitrary"),
            vmem_limit_bytes=32 * 1024 * 1024,
        ),
    )(lo_tbl, hi_tbl, seg, ids4, bary4)
    return out[:, :V].astype(seg_maps.dtype)


def _reference_numpy(seg_maps, p2v_maps, bary_maps, V, threshold=0.3):
    """Pure numpy re-implementation of the PyTorch forward (scatter_add)."""
    seg = np.asarray(seg_maps, dtype=np.float32)[0]      # [C, H, W]
    p2v = np.asarray(p2v_maps)                           # [C, H, W, 3]
    bary = np.asarray(bary_maps, dtype=np.float32)
    C = seg.shape[0]
    pred = np.zeros((V,), np.float32)
    cnt = np.zeros((V,), np.float32)
    for c in range(C):
        probs = 1.0 / (1.0 + np.exp(-seg[c].reshape(-1)))
        active = probs > threshold
        verts = p2v[c].reshape(-1, 3)
        wts = bary[c].reshape(-1, 3)
        valid = np.all((verts >= 0) & (verts < V), axis=1)
        sel = active & valid
        votes = np.zeros((V,), np.float32)
        counts = np.zeros((V,), np.float32)
        for i in range(3):
            np.add.at(votes, verts[sel, i], wts[sel, i] * probs[sel])
            np.add.at(counts, verts[sel, i], wts[sel, i])
        has = counts > 0
        votes[has] /= counts[has]
        pred += votes
        cnt += has.astype(np.float32)
    ok = cnt > 0
    pred[ok] /= cnt[ok]
    return pred[None, :]


if __name__ == "__main__":
    # Module has no learnable weights; its "parameters" are the per-view
    # pixel->vertex / barycentric maps (normally loaded from .npz / joblib).
    key = jax.random.PRNGKey(0)
    k_seg, k_p2v, k_bary = jax.random.split(key, 3)

    batch = 1                 # module asserts batch_size == 1
    views = 4                 # multiview_channels
    mask_size = 16            # H = W
    num_vertices = 300        # not a multiple of 128: exercises vertex padding
    threshold = 0.3

    seg_maps = jax.random.normal(
        k_seg, (batch, views, mask_size, mask_size), jnp.float32)
    # vertex ids in [-1, V): includes invalid (-1) pixels like real p2v maps
    p2v_maps = jax.random.randint(
        k_p2v, (views, mask_size, mask_size, 3), -1, num_vertices,
        dtype=jnp.int32)
    bary_raw = jax.random.uniform(
        k_bary, (views, mask_size, mask_size, 3), jnp.float32,
        minval=0.05, maxval=1.0)
    bary_maps = bary_raw / jnp.sum(bary_raw, axis=-1, keepdims=True)

    ref = _reference_numpy(seg_maps, p2v_maps, bary_maps, num_vertices,
                           threshold=threshold)

    # f32 path with small tiles: exercises multi pixel tiles, the in-kernel
    # multi-chunk vertex loop, the tile-skip path and the 2-way vertex split.
    out_f32 = object_mesh_contact3d_forward(
        seg_maps, p2v_maps, bary_maps, num_vertices,
        ds_names=("ocontact_demo",), threshold=threshold,
        block_pixels=128, block_vertices=128, num_vertex_splits=2,
        compute_dtype=jnp.float32)
    out_f32 = jax.block_until_ready(out_f32)
    np.testing.assert_allclose(np.asarray(out_f32), ref, rtol=5e-4, atol=1e-5)

    # Default bf16 MXU-operand path (v6e/v7x native), default large tiles.
    out_bf16 = object_mesh_contact3d_forward(
        seg_maps, p2v_maps, bary_maps, num_vertices,
        ds_names=("ocontact_demo",), threshold=threshold,
        compute_dtype=jnp.bfloat16)
    out_bf16 = jax.block_until_ready(out_bf16)
    np.testing.assert_allclose(np.asarray(out_bf16), ref, rtol=2e-2, atol=5e-3)

    print("KERNEL_OK")
</pallas_src>

<mosaic_0001>
module attributes {stable_mosaic.version = 11 : i64} {
  func.func @_contact3d_kernel(%arg0: i32, %arg1: i32, %arg2: i32, %arg3: memref<4x2xi32, #tpu.memory_space<smem>>, %arg4: memref<4x2xi32, #tpu.memory_space<smem>>, %arg5: memref<1x1x128xf32, #tpu.memory_space<vmem>>, %arg6: memref<1x128x4xi32, #tpu.memory_space<vmem>>, %arg7: memref<1x128x4xf32, #tpu.memory_space<vmem>>, %arg8: memref<1x256xf32, #tpu.memory_space<vmem>>, %arg9: memref<2x256xf32, #tpu.memory_space<vmem>>, %arg10: memref<1x256xf32, #tpu.memory_space<vmem>>) attributes {dimension_semantics = [#tpu.dimension_semantics<parallel>, #tpu.dimension_semantics<arbitrary>, #tpu.dimension_semantics<arbitrary>], iteration_bounds = array<i64: 2, 4, 2>, scalar_prefetch = 2 : i64, scratch_operands = 2 : i64, tpu.core_type = #tpu.core_type<tc>, window_params = [{transform_indices = @transform_0, window_bounds = array<i64: 1, 1, 128>}, {transform_indices = @transform_1, window_bounds = array<i64: 1, 128, 4>}, {transform_indices = @transform_2, window_bounds = array<i64: 1, 128, 4>}, {transform_indices = @transform_3, window_bounds = array<i64: 1, 256>}]} {
    %c0_i32 = arith.constant 0 : i32
    %0 = arith.cmpi eq, %arg1, %c0_i32 : i32
    %c0_i32_0 = arith.constant 0 : i32
    %1 = arith.cmpi eq, %arg2, %c0_i32_0 : i32
    %2 = arith.andi %0, %1 : i1
    %3 = arith.extui %2 : i1 to i32
    %c0_i32_1 = arith.constant 0 : i32
    %4 = arith.cmpi ne, %3, %c0_i32_1 : i32
    scf.if %4 {
      %cst_23 = arith.constant 0.000000e+00 : f32
      %55 = vector.broadcast %cst_23 : f32 to vector<1x256xf32>
      %c0_24 = arith.constant 0 : index
      %c0_25 = arith.constant 0 : index
      %56 = vector.load %arg8[%c0_24, %c0_25] : memref<1x256xf32, #tpu.memory_space<vmem>>, vector<1x256xf32>
      tpu.vector_store %arg8[%c0_24, %c0_25], %55 {strides = array<i32>} : memref<1x256xf32, #tpu.memory_space<vmem>>, vector<1x256xf32>,
      %cst_26 = arith.constant 0.000000e+00 : f32
      %57 = vector.broadcast %cst_26 : f32 to vector<1x256xf32>
      %c0_27 = arith.constant 0 : index
      %c0_28 = arith.constant 0 : index
      %58 = vector.load %arg10[%c0_27, %c0_28] : memref<1x256xf32, #tpu.memory_space<vmem>>, vector<1x256xf32>
      tpu.vector_store %arg10[%c0_27, %c0_28], %57 {strides = array<i32>} : memref<1x256xf32, #tpu.memory_space<vmem>>, vector<1x256xf32>,
    } else {
    }
    %c0_i32_2 = arith.constant 0 : i32
    %5 = arith.cmpi eq, %arg2, %c0_i32_2 : i32
    %6 = arith.extui %5 : i1 to i32
    %c0_i32_3 = arith.constant 0 : i32
    %7 = arith.cmpi ne, %6, %c0_i32_3 : i32
    scf.if %7 {
      %cst_23 = arith.constant 0.000000e+00 : f32
      %55 = vector.broadcast %cst_23 : f32 to vector<2x256xf32>
      %c0_24 = arith.constant 0 : index
      %c0_25 = arith.constant 0 : index
      %56 = vector.load %arg9[%c0_24, %c0_25] : memref<2x256xf32, #tpu.memory_space<vmem>>, vector<2x256xf32>
      tpu.vector_store %arg9[%c0_24, %c0_25], %55 {strides = array<i32>} : memref<2x256xf32, #tpu.memory_space<vmem>>, vector<2x256xf32>,
    } else {
    }
    %c0 = arith.constant 0 : index
    %c0_4 = arith.constant 0 : index
    %c0_5 = arith.constant 0 : index
    %8 = vector.load %arg5[%c0, %c0_4, %c0_5] : memref<1x1x128xf32, #tpu.memory_space<vmem>>, vector<1x1x128xf32>
    %9 = vector.shape_cast %8 : vector<1x1x128xf32> to vector<1x128xf32>
    %10 = arith.negf %9 : vector<1x128xf32>
    %11 = math.exp %10 : vector<1x128xf32>
    %cst = arith.constant 1.000000e+00 : f32
    %12 = vector.broadcast %cst : f32 to vector<1x128xf32>
    %13 = arith.addf %12, %11 : vector<1x128xf32>
    %14 = arith.divf %12, %13 : vector<1x128xf32>
    %cst_6 = arith.constant 3.000000e-01 : f32
    %15 = vector.broadcast %cst_6 : f32 to vector<1x128xf32>
    %16 = arith.cmpf ogt, %14, %15 : vector<1x128xf32>
    %17 = tpu.iota {dimensions = array<i32: 0>} : vector<2x128xi32>
    %c0_i32_7 = arith.constant 0 : i32
    %18 = vector.broadcast %c0_i32_7 : i32 to vector<2x128xi32>
    %19 = arith.cmpi eq, %17, %18 : vector<2x128xi32>
    %cst_8 = arith.constant 1.000000e+00 : f32
    %20 = vector.shape_cast %14 : vector<1x128xf32> to vector<1x128xf32>
    %21 = vector.broadcast %20 : vector<1x128xf32> to vector<2x128xf32>
    %22 = vector.broadcast %cst_8 : f32 to vector<2x128xf32>
    %23 = arith.select %19, %21, %22 : vector<2x128xi1>, vector<2x128xf32>
    %cst_9 = arith.constant 0.000000e+00 : f32
    %24 = vector.shape_cast %16 : vector<1x128xi1> to vector<1x128xi1>
    %25 = vector.broadcast %24 : vector<1x128xi1> to vector<2x128xi1>
    %26 = vector.broadcast %cst_9 : f32 to vector<2x128xf32>
    %27 = arith.select %25, %23, %26 : vector<2x128xi1>, vector<2x128xf32>
    %c0_10 = arith.constant 0 : index
    %c0_11 = arith.constant 0 : index
    %c0_12 = arith.constant 0 : index
    %28 = vector.load %arg6[%c0_10, %c0_11, %c0_12] : memref<1x128x4xi32, #tpu.memory_space<vmem>>, vector<1x128x4xi32>
    %29 = vector.shape_cast %28 : vector<1x128x4xi32> to vector<128x4xi32>
    %30 = vector.extract_strided_slice %29 {offsets = [0, 0], sizes = [128, 1], strides = [1, 1]} : vector<128x4xi32> to vector<128x1xi32>
    %31 = vector.extract_strided_slice %29 {offsets = [0, 1], sizes = [128, 1], strides = [1, 1]} : vector<128x4xi32> to vector<128x1xi32>
    %32 = vector.extract_strided_slice %29 {offsets = [0, 2], sizes = [128, 1], strides = [1, 1]} : vector<128x4xi32> to vector<128x1xi32>
    %c0_13 = arith.constant 0 : index
    %c0_14 = arith.constant 0 : index
    %c0_15 = arith.constant 0 : index
    %33 = vector.load %arg7[%c0_13, %c0_14, %c0_15] : memref<1x128x4xf32, #tpu.memory_space<vmem>>, vector<1x128x4xf32>
    %34 = vector.shape_cast %33 : vector<1x128x4xf32> to vector<128x4xf32>
    %35 = vector.extract_strided_slice %34 {offsets = [0, 0], sizes = [128, 1], strides = [1, 1]} : vector<128x4xf32> to vector<128x1xf32>
    %36 = vector.extract_strided_slice %34 {offsets = [0, 1], sizes = [128, 1], strides = [1, 1]} : vector<128x4xf32> to vector<128x1xf32>
    %37 = vector.extract_strided_slice %34 {offsets = [0, 2], sizes = [128, 1], strides = [1, 1]} : vector<128x4xf32> to vector<128x1xf32>
    %38 = tpu.iota {dimensions = array<i32: 1>} : vector<128x128xi32>
    %39 = arith.index_cast %arg1 : i32 to index
    %40 = arith.index_cast %arg2 : i32 to index
    %41 = memref.load %arg3[%39, %40] : memref<4x2xi32, #tpu.memory_space<smem>>
    %42 = arith.index_cast %arg1 : i32 to index
    %43 = arith.index_cast %arg2 : i32 to index
    %44 = memref.load %arg4[%42, %43] : memref<4x2xi32, #tpu.memory_space<smem>>
    %c256_i32 = arith.constant 256 : i32
    %45 = arith.muli %arg0, %c256_i32 : i32
    %cst_16 = arith.constant 0.000000e+00 : f32
    %c0_i32_17 = arith.constant 0 : i32
    %c2_i32 = arith.constant 2 : i32
    %46 = arith.addi %c0_i32_17, %c2_i32 : i32
    %c1_i32 = arith.constant 1 : i32
    scf.for %arg11 = %c0_i32_17 to %46 step %c1_i32  : i32 {
      %c1_i32_23 = arith.constant 1 : i32
      %55 = arith.muli %arg11, %c1_i32_23 : i32
      %c0_i32_24 = arith.constant 0 : i32
      %56 = arith.addi %c0_i32_24, %55 : i32
      %c128_i32 = arith.constant 128 : i32
      %57 = arith.muli %56, %c128_i32 : i32
      %58 = arith.addi %45, %57 : i32
      %59 = arith.cmpi sge, %44, %58 : i32
      %c128_i32_25 = arith.constant 128 : i32
      %60 = arith.addi %58, %c128_i32_25 : i32
      %61 = arith.cmpi slt, %41, %60 : i32
      %62 = arith.andi %59, %61 : i1
      %63 = arith.extui %62 : i1 to i32
      %c0_i32_26 = arith.constant 0 : i32
      %64 = arith.cmpi ne, %63, %c0_i32_26 : i32
      scf.if %64 {
        %65 = vector.broadcast %58 : i32 to vector<128x1xi32>
        %66 = arith.subi %30, %65 : vector<128x1xi32>
        %67 = vector.broadcast %66 : vector<128x1xi32> to vector<128x128xi32>
        %68 = arith.cmpi eq, %67, %38 : vector<128x128xi32>
        %69 = vector.shape_cast %35 : vector<128x1xf32> to vector<128x1xf32>
        %70 = vector.broadcast %69 : vector<128x1xf32> to vector<128x128xf32>
        %71 = vector.broadcast %cst_16 : f32 to vector<128x128xf32>
        %72 = arith.select %68, %70, %71 : vector<128x128xi1>, vector<128x128xf32>
        %73 = vector.broadcast %58 : i32 to vector<128x1xi32>
        %74 = arith.subi %31, %73 : vector<128x1xi32>
        %75 = vector.broadcast %74 : vector<128x1xi32> to vector<128x128xi32>
        %76 = arith.cmpi eq, %75, %38 : vector<128x128xi32>
        %77 = vector.shape_cast %36 : vector<128x1xf32> to vector<128x1xf32>
        %78 = vector.broadcast %77 : vector<128x1xf32> to vector<128x128xf32>
        %79 = vector.broadcast %cst_16 : f32 to vector<128x128xf32>
        %80 = arith.select %76, %78, %79 : vector<128x128xi1>, vector<128x128xf32>
        %81 = arith.addf %72, %80 : vector<128x128xf32>
        %82 = vector.broadcast %58 : i32 to vector<128x1xi32>
        %83 = arith.subi %32, %82 : vector<128x1xi32>
        %84 = vector.broadcast %83 : vector<128x1xi32> to vector<128x128xi32>
        %85 = arith.cmpi eq, %84, %38 : vector<128x128xi32>
        %86 = vector.shape_cast %37 : vector<128x1xf32> to vector<128x1xf32>
        %87 = vector.broadcast %86 : vector<128x1xf32> to vector<128x128xf32>
        %88 = vector.broadcast %cst_16 : f32 to vector<128x128xf32>
        %89 = arith.select %85, %87, %88 : vector<128x128xi1>, vector<128x128xf32>
        %90 = arith.addf %81, %89 : vector<128x128xf32>
        %cst_27 = arith.constant dense<0.000000e+00> : vector<2x128xf32>
        %91 = tpu.matmul %27, %90, %cst_27 {dimension_numbers = #tpu.dot_dimension_numbers<[1], [0], [0], [1], [0, 0, 1, 1], [], []>, precision = #tpu.contract_precision<fp32>} : vector<2x128xf32>, vector<128x128xf32>, vector<2x128xf32> -> vector<2x128xf32>
        %c128_i32_28 = arith.constant 128 : i32
        %92 = arith.muli %56, %c128_i32_28 : i32
        %93 = tpu.assume_multiple %92, 128 : i32
        %c0_29 = arith.constant 0 : index
        %94 = arith.index_cast %93 : i32 to index
        %95 = vector.load %arg9[%c0_29, %94] : memref<2x256xf32, #tpu.memory_space<vmem>>, vector<2x128xf32>
        %96 = arith.addf %95, %91 : vector<2x128xf32>
        %c0_30 = arith.constant 0 : index
        %97 = arith.index_cast %93 : i32 to index
        %98 = vector.load %arg9[%c0_30, %97] : memref<2x256xf32, #tpu.memory_space<vmem>>, vector<2x128xf32>
        tpu.vector_store %arg9[%c0_30, %97], %96 {strides = array<i32>} : memref<2x256xf32, #tpu.memory_space<vmem>>, vector<2x128xf32>,
      } else {
      }
    }
    %c2_i32_18 = arith.constant 2 : i32
    %c1_i32_19 = arith.constant 1 : i32
    %47 = arith.cmpi eq, %arg2, %c1_i32_19 : i32
    %48 = arith.extui %47 : i1 to i32
    %c0_i32_20 = arith.constant 0 : i32
    %49 = arith.cmpi ne, %48, %c0_i32_20 : i32
    scf.if %49 {
      %c0_23 = arith.constant 0 : index
      %c0_24 = arith.constant 0 : index
      %55 = vector.load %arg9[%c0_23, %c0_24] : memref<2x256xf32, #tpu.memory_space<vmem>>, vector<1x256xf32>
      %c1 = arith.constant 1 : index
      %c0_25 = arith.constant 0 : index
      %56 = vector.load %arg9[%c1, %c0_25] : memref<2x256xf32, #tpu.memory_space<vmem>>, vector<1x256xf32>
      %cst_26 = arith.constant 0.000000e+00 : f32
      %57 = vector.broadcast %cst_26 : f32 to vector<1x256xf32>
      %58 = arith.cmpf ogt, %56, %57 : vector<1x256xf32>
      %c0_27 = arith.constant 0 : index
      %c0_28 = arith.constant 0 : index
      %59 = vector.load %arg8[%c0_27, %c0_28] : memref<1x256xf32, #tpu.memory_space<vmem>>, vector<1x256xf32>
      %cst_29 = arith.constant 1.000000e+00 : f32
      %60 = vector.broadcast %cst_29 : f32 to vector<1x256xf32>
      %61 = arith.select %58, %56, %60 : vector<1x256xi1>, vector<1x256xf32>
      %62 = arith.divf %55, %61 : vector<1x256xf32>
      %cst_30 = arith.constant 0.000000e+00 : f32
      %63 = vector.broadcast %cst_30 : f32 to vector<1x256xf32>
      %64 = arith.select %58, %62, %63 : vector<1x256xi1>, vector<1x256xf32>
      %65 = arith.addf %59, %64 : vector<1x256xf32>
      %c0_31 = arith.constant 0 : index
      %c0_32 = arith.constant 0 : index
      %66 = vector.load %arg8[%c0_31, %c0_32] : memref<1x256xf32, #tpu.memory_space<vmem>>, vector<1x256xf32>
      tpu.vector_store %arg8[%c0_31, %c0_32], %65 {strides = array<i32>} : memref<1x256xf32, #tpu.memory_space<vmem>>, vector<1x256xf32>,
      %c0_33 = arith.constant 0 : index
      %c0_34 = arith.constant 0 : index
      %67 = vector.load %arg10[%c0_33, %c0_34] : memref<1x256xf32, #tpu.memory_space<vmem>>, vector<1x256xf32>
      %68 = arith.extui %58 : vector<1x256xi1> to vector<1x256xi32>
      %69 = arith.sitofp %68 : vector<1x256xi32> to vector<1x256xf32>
      %70 = arith.addf %67, %69 : vector<1x256xf32>
      %c0_35 = arith.constant 0 : index
      %c0_36 = arith.constant 0 : index
      %71 = vector.load %arg10[%c0_35, %c0_36] : memref<1x256xf32, #tpu.memory_space<vmem>>, vector<1x256xf32>
      tpu.vector_store %arg10[%c0_35, %c0_36], %70 {strides = array<i32>} : memref<1x256xf32, #tpu.memory_space<vmem>>, vector<1x256xf32>,
    } else {
    }
    %c3_i32 = arith.constant 3 : i32
    %50 = arith.cmpi eq, %arg1, %c3_i32 : i32
    %c1_i32_21 = arith.constant 1 : i32
    %51 = arith.cmpi eq, %arg2, %c1_i32_21 : i32
    %52 = arith.andi %50, %51 : i1
    %53 = arith.extui %52 : i1 to i32
    %c0_i32_22 = arith.constant 0 : i32
    %54 = arith.cmpi ne, %53, %c0_i32_22 : i32
    scf.if %54 {
      %c0_23 = arith.constant 0 : index
      %c0_24 = arith.constant 0 : index
      %55 = vector.load %arg10[%c0_23, %c0_24] : memref<1x256xf32, #tpu.memory_space<vmem>>, vector<1x256xf32>
      %cst_25 = arith.constant 0.000000e+00 : f32
      %56 = vector.broadcast %cst_25 : f32 to vector<1x256xf32>
      %57 = arith.cmpf ogt, %55, %56 : vector<1x256xf32>
      %c0_26 = arith.constant 0 : index
      %c0_27 = arith.constant 0 : index
      %58 = vector.load %arg8[%c0_26, %c0_27] : memref<1x256xf32, #tpu.memory_space<vmem>>, vector<1x256xf32>
      %cst_28 = arith.constant 1.000000e+00 : f32
      %59 = vector.broadcast %cst_28 : f32 to vector<1x256xf32>
      %60 = arith.select %57, %55, %59 : vector<1x256xi1>, vector<1x256xf32>
      %61 = arith.divf %58, %60 : vector<1x256xf32>
      %cst_29 = arith.constant 0.000000e+00 : f32
      %62 = vector.broadcast %cst_29 : f32 to vector<1x256xf32>
      %63 = arith.select %57, %61, %62 : vector<1x256xi1>, vector<1x256xf32>
      %c0_30 = arith.constant 0 : index
      %c0_31 = arith.constant 0 : index
      %64 = vector.load %arg8[%c0_30, %c0_31] : memref<1x256xf32, #tpu.memory_space<vmem>>, vector<1x256xf32>
      tpu.vector_store %arg8[%c0_30, %c0_31], %63 {strides = array<i32>} : memref<1x256xf32, #tpu.memory_space<vmem>>, vector<1x256xf32>,
    } else {
    }
    return
  }
  func.func @transform_0(%arg0: i32, %arg1: i32, %arg2: i32, %arg3: memref<4x2xi32, #tpu.memory_space<smem>>, %arg4: memref<4x2xi32, #tpu.memory_space<smem>>) -> (i32, i32, i32) {
    %c0_i32 = arith.constant 0 : i32
    %c0_i32_0 = arith.constant 0 : i32
    return %arg1, %c0_i32, %arg2 : i32, i32, i32
  }
  func.func @transform_1(%arg0: i32, %arg1: i32, %arg2: i32, %arg3: memref<4x2xi32, #tpu.memory_space<smem>>, %arg4: memref<4x2xi32, #tpu.memory_space<smem>>) -> (i32, i32, i32) {
    %c0_i32 = arith.constant 0 : i32
    %c0_i32_0 = arith.constant 0 : i32
    return %arg1, %arg2, %c0_i32 : i32, i32, i32
  }
  func.func @transform_2(%arg0: i32, %arg1: i32, %arg2: i32, %arg3: memref<4x2xi32, #tpu.memory_space<smem>>, %arg4: memref<4x2xi32, #tpu.memory_space<smem>>) -> (i32, i32, i32) {
    %c0_i32 = arith.constant 0 : i32
    %c0_i32_0 = arith.constant 0 : i32
    return %arg1, %arg2, %c0_i32 : i32, i32, i32
  }
  func.func @transform_3(%arg0: i32, %arg1: i32, %arg2: i32, %arg3: memref<4x2xi32, #tpu.memory_space<smem>>, %arg4: memref<4x2xi32, #tpu.memory_space<smem>>) -> (i32, i32) {
    %c0_i32 = arith.constant 0 : i32
    %c0_i32_0 = arith.constant 0 : i32
    return %c0_i32, %arg0 : i32, i32
  }
}

</mosaic_0001>

<bundles_post_ra>
// kernel: tpu_custom_call.1
= control target key start
LH: loop header
LB: loop body
LE: loop exit
PB: predicated region body
PF: predicated region fallthrough
CT: control target
= control target key end

     0   :  { %s3428_s0 = inlined_call_operand.vmem [shape: s32[4,2], index: 0, kind: input, shape index: {}]   ;;  %s3429_s2 = inlined_call_operand.vmem [shape: f32[4,1,256], index: 2, kind: input, shape index: {}]   ;;  %s3430_s3 = inlined_call_operand.vmem [shape: s32[4,256,4], index: 3, kind: input, shape index: {}]   ;;  %s3431_s4 = inlined_call_operand.vmem [shape: f32[4,256,4], index: 4, kind: input, shape index: {}]   ;;  %s3432_s5 = inlined_call_operand.hbm [shape: f32[1,512], index: 5, kind: output, shape index: {}]   ;;  %s3433_s1 = inlined_call_operand.vmem [shape: s32[4,2], index: 1, kind: input, shape index: {}]  }
   0x1   :  { %s10_s20 = sshll.u32 %s3428_s0, 4  ;;  %s14_s23 = sshll.u32 %s3433_s1, 4  ;;  %s11_s20 = int_to_ptr.vmem [resolvable:$true] %s10_s20  ;;  %s15_s23 = int_to_ptr.vmem [resolvable:$true] %s14_s23 }
   0x2   :  { %s2344_s24 = scalar_lea.vmem %s11_s20, 64  ;;  %p2349_p1 = scmp.lt.s32.totalorder %s11_s20, %s11_s20 }
   0x3   :  { %p2345_p0 = scmp.ne.s32.totalorder %s11_s20, %s2344_s24  ;;  %p2350_p2 = scmp.lt.s32.totalorder %s2344_s24, %s2344_s24 }
   0x5   :  { %p2351_p3 = por %p2350_p2, %p2349_p1 }
   0x7   :  { %p2352_p4 = pnand %p2351_p3, %p2345_p0 }
   0x9   :  { %2355 = shalt.err (!%p2352_p4)  }
   0xa   :  { %s2490_s25 = smov [#allocation5]   ;;  %s2356_s26 = scalar_lea.vmem %s15_s23, 64 }
   0xb   :  { %13 = dma.vmem_to_smem %s11_s20, 64, %s2490_s25, [#allocation4] }
   0xc   :  { %p2357_p5 = scmp.ne.s32.totalorder %s15_s23, %s2356_s26  ;;  %p2361_p6 = scmp.lt.s32.totalorder %s15_s23, %s15_s23 }
   0xd   :  { %p2362_p7 = scmp.lt.s32.totalorder %s2356_s26, %s2356_s26 }
   0xf   :  { %p2363_p8 = por %p2362_p7, %p2361_p6 }
  0x11   :  { %p2364_p9 = pnand %p2363_p8, %p2357_p5 }
  0x13   :  { %2367 = shalt.err (!%p2364_p9)  }
  0x14   :  { %s2491_s0 = smov [#allocation6]  }
  0x15   :  { %17 = dma.vmem_to_smem %s15_s23, 64, %s2491_s0, [#allocation4] }
  0x16   :  { %2440 = dma.done.wait [#allocation4], 128 }
  0x17   :  { %2441 = vsyncadd [#allocation4], 4294967168 }
  0x18   :  { %19 = sfence }
  0x19   :  { %20 = vsyncpa [#allocation8], 0 }
  0x1a   :  { %22 = vsyncpa [#allocation8 + $0x1], 0  ;;  %s2539_s1 = smov 0   ;;  %s2541_s27 = smov 0  }
  0x1b   :  { %s2543_s28 = smov 0   ;;  %s2545_s29 = smov 0  }
  0x1c   :  { %s2547_s30 = smov 0   ;;  %s2549_s6 = smov 0  }
  0x1d   :  { %s2551_s7 = smov 0   ;;  %s2553_s8 = smov 0  }
  0x1e   :  { %s2555_s9 = smov 0   ;;  %s2557_s10 = smov 0  }
  0x1f LB: > { %3456 = sst [smem:[#allocation11_spill]] %s2472_s7  ;;  %s1704_s11 = sadd.s32 4294967295, %s2484_s10   ;;  %s2484_s10 = sphi %s2557_s10, %s28_s10   ;;  %s2480_s9 = sphi %s2555_s9, %s3527_s9   ;;  %s2476_s8 = sphi %s2553_s8, %s3526_s8   ;;  %s2472_s7 = sphi %s2551_s7, %s3525_s7   ;;  %s2468_s6 = sphi %s2549_s6, %s3524_s6   ;;  %s2464_s30 = sphi %s2547_s30, %s3523_s30   ;;  %s2460_s29 = sphi %s2545_s29, %s3522_s29   ;;  %s2456_s28 = sphi %s2543_s28, %s3530_s28   ;;  %s2452_s27 = sphi %s2541_s27, %s3529_s27   ;;  %s2448_s1 = sphi %s2539_s1, %s3528_s1  }
  0x20   : > { %3457 = sst [smem:[#allocation12_spill]] %s2476_s8  ;;  %s1705_s12 = sadd.s32 4294967294, %s2484_s10  }
  0x21   : > { %3458 = sst [smem:[#allocation13_spill]] %s2480_s9  ;;  %s40_s13 = sadd.s32 1, %s2472_s7 }
  0x22   : > { %p41_p10 = scmp.ge.s32.totalorder %s40_s13, 2  ;;  %s43_s14 = sadd.s32 1, %s2476_s8 }
  0x23   : > { %s47_s15 = sadd.s32 1, %s2480_s9  ;;  %p148_p11 = scmp.ne.s32.totalorder %s2456_s28, %s2452_s27 }
  0x24   : > { %s3532_s13 = smov (%p41_p10, %s40_s13), 0  ;;  %s3534_s14 = smov (!%p41_p10, %s43_s14), %s2476_s8 }
  0x25   : > { %3459 = sst [smem:[#allocation14_spill]] %s3532_s13  ;;  %p149_p12 = scmp.eq.s32.totalorder %s1704_s11, 15 }
  0x26   : > { %p154_p13 = scmp.ne.s32.totalorder %s2452_s27, %s2448_s1  ;;  %p45_p0 = scmp.ge.s32.totalorder %s3534_s14, 4 }
  0x27   : > { %p155_p1 = scmp.eq.s32.totalorder %s1705_s12, 15  ;;  %p2601_p2 = por %p149_p12, %p148_p11 }
  0x28   : > { %p1708_p3 = scmp.ge.s32.totalorder %s2484_s10, 1  ;;  %s3536_s14 = smov (%p45_p0, %s3534_s14), 0 }
  0x29   : > { %3461 = sst [smem:[#allocation15_spill]] %s3536_s14  ;;  %s3538_s15 = smov (!%p45_p0, %s47_s15), %s2480_s9 }
  0x2a   : > { %p2609_p4 = por %p155_p1, %p154_p13  ;;  %p209_p5 = scmp.lt.s32.totalorder %s2484_s10, 17 }
  0x2b   : > { %p49_p6 = scmp.ge.s32.totalorder %s3538_s15, 2  ;;  %s138_s19 = sadd.s32 1, %s2456_s28 }
  0x2c   : > { %p210_p7 = pnand %p1708_p3, %p209_p5 }
  0x2d   : > { %s3540_s15 = smov (%p49_p6, %s3538_s15), 0 }
  0x2e   : > { %3463 = sst [smem:[#allocation16_spill]] %s3540_s15  ;;  %s135_s18 = ssub.s32 %s2480_s9, %s3540_s15 }
  0x2f   : > { %p136_p8 = scmp.eq.s32.totalorder %s135_s18, 0  ;;  %213 = sbr.rel (%p210_p7) target bundleno = 899 (0x383), region = 32 }
  0x31   : > { %s2620_s20 = scalar_select %p136_p8, %s2456_s28, %s138_s19  }
  0x36   : > { %s3435_s21 = sand.u32 1, %s2452_s27   ;;  %p253_p9 = scmp.lt.s32.totalorder %s2464_s30, 3 }
  0x37   : > { %s1709_s22 = sshll.u32 %s3435_s21, 1  ;;  %p255_p10 = scmp.lt.s32.totalorder %s2460_s29, 1 }
  0x38   : > { %s1711_s23 = sshll.u32 %s2460_s29, 4  ;;  %p281_p12 = scmp.eq.s32.totalorder %s2464_s30, 0 }
  0x39   : > { %s254_s24 = scalar_select %p253_p9, %s2464_s30, 3 }
  0x3a   : > { %s256_s25 = scalar_select %p255_p10, %s2460_s29, 1 }
  0x3b   : > { %s1710_s26 = sshll.u32 %s254_s24, 1  ;;  %p263_p11 = scmp.lt.s32.totalorder %s1711_s23, 31 }
  0x3c   : > { %s258_s0 = sadd.s32 %s1710_s26, %s256_s25  ;;  %s1712_s11 = sshll.u32 %s254_s24, 5 }
  0x3d   : > { %s259_s19 = scalar_lea.vmem %s3429_s2, %s258_s0  ;;  %s3542_s23 = smov (!%p263_p11, %s1711_s23), 31 }
  0x3e   : > { %p282_p13 = scmp.eq.s32.totalorder %s2460_s29, 0  ;;  %s266_s15 = sadd.s32 %s1712_s11, %s3542_s23 }
  0x3f   : > { %s1713_s14 = sshll.u32 %s266_s15, 3  ;;  %s2645_s24 = scalar_lea.vmem [#allocation7], %s1709_s22 }
  0x40   : > { %p283_p0 = pnand %p282_p13, %p281_p12  ;;  %s2638_s9 = scalar_lea.vmem %s3430_s3, %s1713_s14 }
  0x41   : > { %s2643_s25 = scalar_lea.vmem %s3431_s4, %s1713_s14  ;;  %v287_v0 = vlaneseq (!%p283_p0)  ;;  %v2492_v1 = vmov (!%p283_p0), 0.0  }
  0x42   : > { %286 = sbr.rel (%p283_p0) target bundleno = 73 (0x49), region = 36 }
  0x43   : > { %vm289_vm0 = vcmp.lt.s32.totalorder (!%p283_p0), %v287_v0, 256 }
  0x44   : > { %291 = vst.msk [vmem:[%s2645_s24] sm:$0x3] (!%p283_p0), %vm289_vm0, %v2492_v1  ;;  %292 = vst.msk [vmem:[#allocation3] sm:$0x3] (!%p283_p0), %vm289_vm0, %v2492_v1 }
  0x49 PF: > { %p1717_p1 = scmp.ne.s32.totalorder %s2460_s29, 0 }
  0x4a   : > { %v2493_v2 = vmov (!%p1717_p1), 0.0  }
  0x4b   : > { %295 = sbr.rel (%p1717_p1) target bundleno = 82 (0x52), region = 40  ;;  %296 = vst [vmem:[#allocation2] sm:$0xf] (!%p1717_p1), %v2493_v2 }
  0x52 PF: > { %v297_v3 = vld [vmem:[%s259_s19] sm:$0x1]  ;;  %v3439_v4 = vlaneseq  ;;  %v2653_v6 = vld [vmem:[%s2638_s9 + $0x8] sm:$0xff]  ;;  %s356_s7 = sshra.s32 %s2460_s29, 7  ;;  %v2657_v8 = vld [vmem:[%s2638_s9 + $0x10] sm:$0xff]  ;;  %s361_s13 = sand.u32 127, %s2460_s29 }
  0x53   : > { %v2650_v5 = vld [vmem:[%s2638_s9] sm:$0xff]  ;;  %3465 = vst [vmem:[#allocation18_spill] sm:$0xff] %v2653_v6  ;;  %v1718_v7 = vmul.f32 -1.442695, %v297_v3  ;;  %3466 = vst [vmem:[#allocation19_spill] sm:$0xff] %v2657_v8  ;;  %v2660_v9 = vld [vmem:[%s2638_s9 + $0x18] sm:$0xff]  ;;  %s358_s8 = sadd.s32 %s2464_s30, %s356_s7 }
  0x54   : > { %3464 = vst [vmem:[#allocation17_spill] sm:$0xff] %v2650_v5  ;;  %3467 = vst [vmem:[#allocation20_spill] sm:$0xff] %v2660_v9  ;;  %v2663_v10 = vld [vmem:[%s2638_s9 + $0x20] sm:$0xff]  ;;  %v2668_v11 = vld [vmem:[%s2638_s9 + $0x28] sm:$0xff]  ;;  %v2677_v14 = vand.u32 127, %v3439_v4  ;;  %s1719_s14 = sshll.u32 %s358_s8, 7 }
  0x55   : > { %3468 = vst [vmem:[#allocation21_spill] sm:$0xff] %v2663_v10  ;;  %3469 = vst [vmem:[#allocation22_spill] sm:$0xff] %v2668_v11  ;;  %v2671_v12 = vld [vmem:[%s2638_s9 + $0x30] sm:$0xff]  ;;  %v2674_v13 = vld [vmem:[%s2638_s9 + $0x38] sm:$0xff]  ;;  %2294 = vpow2.f32 %v1718_v7  ;;  %s362_s15 = sadd.s32 %s1719_s14, %s361_s13  ;;  %s1720_s21 = sshll.u32 %s2468_s6, 8  ;;  %v306_v41 = vshrl.u32 %v3439_v4, 7 }
  0x56   : > { %3470 = vst [vmem:[#allocation23_spill] sm:$0xff] %v2671_v12  ;;  %3471 = vst [vmem:[#allocation24_spill] sm:$0xff] %v2674_v13  ;;  %v2680_v15 = vld [vmem:[%s2638_s9 + $0x40] sm:$0xff]  ;;  %v2683_v16 = vld [vmem:[%s2638_s9 + $0x48] sm:$0xff]  ;;  %s2698_s22 = sld [smem:[#allocation5 + %s362_s15]]  ;;  %v2494_v45 = vmov 0  }
  0x57   : > { %3472 = vst [vmem:[#allocation25_spill] sm:$0xff] %v2680_v15  ;;  %3473 = vst [vmem:[#allocation26_spill] sm:$0xff] %v2683_v16  ;;  %v2686_v17 = vld [vmem:[%s2638_s9 + $0x50] sm:$0xff]  ;;  %v2690_v18 = vld [vmem:[%s2638_s9 + $0x58] sm:$0xff]  ;;  %s2709_s23 = sld [smem:[#allocation6 + %s362_s15]]  ;;  %v311_v42 = vsub.s32 0, %v306_v41 }
  0x58   : > { %3474 = vst [vmem:[#allocation27_spill] sm:$0xff] %v2686_v17  ;;  %3475 = vst [vmem:[#allocation28_spill] sm:$0xff] %v2690_v18  ;;  %v2693_v19 = vld [vmem:[%s2638_s9 + $0x60] sm:$0xff]  ;;  %v2696_v20 = vld [vmem:[%s2638_s9 + $0x68] sm:$0xff]  ;;  %vm307_vm1 = vcmp.eq.s32.totalorder %v306_v41, 0 }
  0x59   : > { %3476 = vst [vmem:[#allocation29_spill] sm:$0xff] %v2693_v19  ;;  %3477 = vst [vmem:[#allocation30_spill] sm:$0xff] %v2696_v20  ;;  %v2701_v21 = vld [vmem:[%s2638_s9 + $0x70] sm:$0xff]  ;;  %v2704_v22 = vld [vmem:[%s2638_s9 + $0x78] sm:$0xff]  ;;  %s2759_s9 = smov 0  }
  0x5a   : > { %3478 = vst [vmem:[#allocation31_spill] sm:$0xff] %v2701_v21  ;;  %3479 = vst [vmem:[#allocation32_spill] sm:$0xff] %v2704_v22  ;;  %v2707_v23 = vld [vmem:[%s2643_s25] sm:$0xff]  ;;  %v2712_v24 = vld [vmem:[%s2643_s25 + $0x8] sm:$0xff] }
  0x5b   : > { %3480 = vst [vmem:[#allocation33_spill] sm:$0xff] %v2707_v23  ;;  %3481 = vst [vmem:[#allocation34_spill] sm:$0xff] %v2712_v24  ;;  %v2715_v25 = vld [vmem:[%s2643_s25 + $0x10] sm:$0xff]  ;;  %v2718_v26 = vld [vmem:[%s2643_s25 + $0x18] sm:$0xff] }
  0x5c   : > { %3482 = vst [vmem:[#allocation35_spill] sm:$0xff] %v2715_v25  ;;  %3483 = vst [vmem:[#allocation36_spill] sm:$0xff] %v2718_v26  ;;  %v2721_v27 = vld [vmem:[%s2643_s25 + $0x20] sm:$0xff]  ;;  %v2724_v28 = vld [vmem:[%s2643_s25 + $0x28] sm:$0xff] }
  0x5d   : > { %3484 = vst [vmem:[#allocation37_spill] sm:$0xff] %v2721_v27  ;;  %3485 = vst [vmem:[#allocation38_spill] sm:$0xff] %v2724_v28  ;;  %v2727_v29 = vld [vmem:[%s2643_s25 + $0x30] sm:$0xff]  ;;  %v2730_v30 = vld [vmem:[%s2643_s25 + $0x38] sm:$0xff] }
  0x5e   : > { %3486 = vst [vmem:[#allocation39_spill] sm:$0xff] %v2727_v29  ;;  %3487 = vst [vmem:[#allocation40_spill] sm:$0xff] %v2730_v30  ;;  %v2733_v31 = vld [vmem:[%s2643_s25 + $0x40] sm:$0xff]  ;;  %v2736_v32 = vld [vmem:[%s2643_s25 + $0x48] sm:$0xff] }
  0x5f   : > { %v2739_v33 = vld [vmem:[%s2643_s25 + $0x50] sm:$0xff]  ;;  %v2742_v34 = vld [vmem:[%s2643_s25 + $0x58] sm:$0xff]  ;;  %v2745_v35 = vld [vmem:[%s2643_s25 + $0x60] sm:$0xff]  ;;  %v2295_v39 = vpop.eup %2294 }
  0x60   : > { %v2748_v36 = vld [vmem:[%s2643_s25 + $0x68] sm:$0xff]  ;;  %v2751_v37 = vld [vmem:[%s2643_s25 + $0x70] sm:$0xff]  ;;  %v2754_v38 = vld [vmem:[%s2643_s25 + $0x78] sm:$0xff]  ;;  %v301_v40 = vadd.f32 1.0, %v2295_v39 }
  0x62   : > { %2296 = vrcp.f32 %v301_v40 }
  0x6c   : > { %v2297_v43 = vpop.eup %2296 }
  0x6d   : > { %vm304_vm2 = vcmp.gt.f32.partialorder %v2297_v43, 0.3  ;;  %v312_v44 = vrot.slane %v2297_v43, %v311_v42 }
  0x6e   : > { %v315_v46 = vsel %vm304_vm2, 1, %v2494_v45 }
  0x6f   : > { %v314_v47 = vsel %vm307_vm1, %v312_v44, 1.0  ;;  %v319_v48 = vrot.slane %v315_v46, %v311_v42 }
  0x71   : > { %vm320_vm3 = vcmp.eq.s32.totalorder %v319_v48, 1 }
  0x72   : > { %v2757_v49 = vsel %vm320_vm3, %v314_v47, 0.0 }
  0x73 LB: >> { %v3488_v30 = vld [vmem:[#allocation40_spill] sm:$0xff]  ;;  %v3489_v29 = vld [vmem:[#allocation39_spill] sm:$0xff]  ;;  %v3490_v28 = vld [vmem:[#allocation38_spill] sm:$0xff]  ;;  %s1721_s26 = sshll.u32 %s2488_s9, 7  ;;  %s2488_s9 = sphi %s2759_s9, %s371_s9  }
  0x74   : >> { %v3491_v27 = vld [vmem:[#allocation37_spill] sm:$0xff]  ;;  %v3492_v26 = vld [vmem:[#allocation36_spill] sm:$0xff]  ;;  %v3493_v25 = vld [vmem:[#allocation35_spill] sm:$0xff]  ;;  %s373_s0 = sadd.s32 %s1721_s26, %s1720_s21 }
  0x75   : >> { %v3494_v24 = vld [vmem:[#allocation34_spill] sm:$0xff]  ;;  %v3495_v23 = vld [vmem:[#allocation33_spill] sm:$0xff]  ;;  %p374_p3 = scmp.ge.s32.totalorder %s2709_s23, %s373_s0  ;;  %s375_s11 = sadd.s32 128, %s373_s0 }
  0x76   : >> { %p376_p5 = scmp.lt.s32.totalorder %s2698_s22, %s375_s11 }
  0x78   : >> { %p377_p6 = pnand %p376_p5, %p374_p3 }
  0x79   : >> { %v2771_v50 = vstv (!%p377_p6), %s373_s0  ;;  %v3444_v51 = vmov (!%p377_p6), 1   ;;  %v3446_v52 = vmov (!%p377_p6), 0   ;;  %v3496_v5 = vld [vmem:[#allocation17_spill] sm:$0xff] (!%p377_p6)  ;;  %v3497_v6 = vld [vmem:[#allocation18_spill] sm:$0xff] (!%p377_p6)  ;;  %v3498_v8 = vld [vmem:[#allocation19_spill] sm:$0xff] (!%p377_p6)  ;;  %v3442_v57 = vmov (!%p377_p6), 2  }
  0x7a   : >> { %380 = sbr.rel (%p377_p6) target bundleno = 821 (0x335), region = 51  ;;  %2299 = vset.pattern.permute.xlu1 (!%p377_p6), %v3444_v51  ;;  %2298 = vset.pattern.permute.xlu0 (!%p377_p6), %v3446_v52  ;;  %v382_v53 = vsub.s32 (!%p377_p6), %v3496_v5, %v2771_v50  ;;  %v2779_v54 = vsub.s32 (!%p377_p6), %v3497_v6, %v2771_v50  ;;  %v2787_v55 = vsub.s32 (!%p377_p6), %v3498_v8, %v2771_v50  ;;  %v3499_v11 = vld [vmem:[#allocation22_spill] sm:$0xff] (!%p377_p6)  ;;  %v3500_v12 = vld [vmem:[#allocation23_spill] sm:$0xff] (!%p377_p6)  ;;  %v3502_v9 = vld [vmem:[#allocation20_spill] sm:$0xff] (!%p377_p6)  ;;  %v3440_v7 = vmov (!%p377_p6), 0.0|0.0   ;;  %s1519_s12 = sshra.s32 (!%p377_p6), %s1721_s26, 7 }
  0x7b   : >> { %v2793_v56 = vsub.s32 (!%p377_p6), %v3499_v11, %v2771_v50  ;;  %v2802_v58 = vsub.s32 (!%p377_p6), %v3500_v12, %v2771_v50  ;;  %v3501_v16 = vld [vmem:[#allocation26_spill] sm:$0xff] (!%p377_p6)  ;;  %v385_v60 = vsub.s32 (!%p377_p6), %v3502_v9, %v2771_v50  ;;  %v3503_v17 = vld [vmem:[#allocation27_spill] sm:$0xff] (!%p377_p6)  ;;  %v3506_v10 = vld [vmem:[#allocation21_spill] sm:$0xff] (!%p377_p6)  ;;  %2043 = vmatprep.subr.bf16.mxu0 (!%p377_p6), %v3440_v7  ;;  %2067 = vmatprep.subr.bf16.mxu1 (!%p377_p6), %v3440_v7  ;;  %v3511_v5 = vmov (!%p377_p6), 1   ;;  %s1722_s18 = sshll.u32 (!%p377_p6), %s1519_s12, 1 }
  0x7c   : >> { %559 = vperm.xlu1 (!%p377_p6), %2299, %v382_v53   ;;  %399 = vperm.xlu0 (!%p377_p6), %2298, %v382_v53   ;;  %v2808_v59 = vsub.s32 (!%p377_p6), %v3501_v16, %v2771_v50  ;;  %v2818_v61 = vsub.s32 (!%p377_p6), %v3503_v17, %v2771_v50  ;;  %v3504_v20 = vld [vmem:[#allocation30_spill] sm:$0xff] (!%p377_p6)  ;;  %v3505_v21 = vld [vmem:[#allocation31_spill] sm:$0xff] (!%p377_p6)  ;;  %v386_v0 = vsub.s32 (!%p377_p6), %v3506_v10, %v2771_v50  ;;  %v3507_v13 = vld [vmem:[#allocation24_spill] sm:$0xff] (!%p377_p6)  ;;  %s1522_s19 = scalar_lea.vmem (!%p377_p6), [#allocation2], %s1722_s18 }
  0x7d   : >> { %v2824_v62 = vsub.s32 (!%p377_p6), %v3504_v20, %v2771_v50  ;;  %v2833_v63 = vsub.s32 (!%p377_p6), %v3505_v21, %v2771_v50  ;;  %v389_v1 = vsub.s32 (!%p377_p6), %v3507_v13, %v2771_v50  ;;  %v3508_v18 = vld [vmem:[#allocation28_spill] sm:$0xff] (!%p377_p6)  ;;  %v3510_v15 = vld [vmem:[#allocation25_spill] sm:$0xff] (!%p377_p6)  ;;  %v3514_v21 = vmov (!%p377_p6), 0  }
  0x7e   : >> { %v2856_v2 = vsub.s32 (!%p377_p6), %v3508_v18, %v2771_v50  ;;  %v3509_v22 = vld [vmem:[#allocation32_spill] sm:$0xff] (!%p377_p6)  ;;  %v390_v43 = vsub.s32 (!%p377_p6), %v3510_v15, %v2771_v50  ;;  %v3512_v15 = vmov (!%p377_p6), 2   ;;  %v3513_v19 = vld [vmem:[#allocation29_spill] sm:$0xff] (!%p377_p6) }
  0x7f   : >> { %v2868_v3 = vsub.s32 (!%p377_p6), %v3509_v22, %v2771_v50  ;;  %v394_v20 = vsub.s32 (!%p377_p6), %v3513_v19, %v2771_v50 }
  0x80   : >> { %562 = vperm.xlu1 (!%p377_p6), %2299, %v2779_v54   ;;  %402 = vperm.xlu0 (!%p377_p6), %2298, %v2779_v54  }
  0x84   : >> { %2300 = vset.pattern.permute.xlu1 %v3446_v52  ;;  %464 = vperm.xlu0 %2298, %v3495_v23  }
  0x85   : >> { %469 = vperm.xlu1 %2300, %v3494_v24  }
  0x88   : >> { %405 = vperm.xlu0 %2298, %v2787_v55  }
  0x89   : >> { %2301 = vset.pattern.permute.xlu1 %v3444_v51 }
  0x8a   : >> { %627 = vperm.xlu1 %2301, %v3494_v24  }
  0x8c   : >> { %414 = vperm.xlu0 %2298, %v2793_v56  }
  0x8e   : >> { %2302 = vset.pattern.permute.xlu1 %v3442_v57 }
  0x8f   : >> { %719 = vperm.xlu1 %2302, %v382_v53  }
  0x90   : >> { %484 = vperm.xlu0 %2298, %v3491_v27  }
  0x93   : >> { %783 = vperm.xlu1 %2302, %v3495_v23  }
  0x94   : >> { %417 = vperm.xlu0 %2298, %v2802_v58  }
  0x97   : >> { %787 = vperm.xlu1 %2302, %v3494_v24  }
  0x98   : >> { %426 = vperm.xlu0 %2298, %v2808_v59  }
  0x9b   : >> { %2303 = vset.pattern.permute.xlu1 %v3446_v52 }
  0x9c   : >> { %408 = vperm.xlu1 %2303, %v385_v60   ;;  %504 = vperm.xlu0 %2298, %v2733_v31  }
  0xa0   : >> { %2304 = vset.pattern.permute.xlu1 %v3444_v51  ;;  %429 = vperm.xlu0 %2298, %v2818_v61  }
  0xa1   : >> { %565 = vperm.xlu1 %2304, %v2787_v55  }
  0xa4   : >> { %438 = vperm.xlu0 %2298, %v2824_v62  }
  0xa5   : >> { %2305 = vset.pattern.permute.xlu1 %v3446_v52 }
  0xa6   : >> { %474 = vperm.xlu1 %2305, %v3493_v25  }
  0xa8   : >> { %524 = vperm.xlu0 %2298, %v2745_v35  }
  0xaa   : >> { %479 = vperm.xlu1 %2305, %v3492_v26  }
  0xac   : >> { %441 = vperm.xlu0 %2298, %v2833_v63  }
  0xae   : >> { %2306 = vset.pattern.permute.xlu1 %v3444_v51 }
  0xaf   : >> { %635 = vperm.xlu1 %2306, %v3492_v26  }
  0xb0   : >> { %2333 = vset.pattern.permute.xlu0 %v3444_v51 }
  0xb1   : >> { %623 = vperm.xlu0 %2333, %v3495_v23  }
  0xb3   : >> { %2307 = vset.pattern.permute.xlu1 %v3442_v57 }
  0xb4   : >> { %728 = vperm.xlu1 %2307, %v385_v60  }
  0xb5   : >> { %568 = vperm.xlu0 %2333, %v385_v60  }
  0xb8   : >> { %791 = vperm.xlu1 %2307, %v3493_v25  }
  0xb9   : >> { %631 = vperm.xlu0 %2333, %v3493_v25  }
  0xbc   : >> { %2308 = vset.pattern.permute.xlu1 %v3446_v52 }
  0xbd   : >> { %411 = vperm.xlu1 %2308, %v386_v0   ;;  %639 = vperm.xlu0 %2333, %v3491_v27  }
  0xc1   : >> { %2309 = vset.pattern.permute.xlu1 %v3444_v51  ;;  %580 = vperm.xlu0 %2333, %v389_v1  }
  0xc2   : >> { %571 = vperm.xlu1 %2309, %v386_v0  }
  0xc5   : >> { %647 = vperm.xlu0 %2333, %v3489_v29  }
  0xc6   : >> { %574 = vperm.xlu1 %2309, %v2793_v56  }
  0xc9   : >> { %655 = vperm.xlu0 %2333, %v2733_v31  }
  0xca   : >> { %2310 = vset.pattern.permute.xlu1 %v3446_v52 }
  0xcb   : >> { %489 = vperm.xlu1 %2310, %v3490_v28  }
  0xcd   : >> { %592 = vperm.xlu0 %2333, %v2856_v2  }
  0xcf   : >> { %2311 = vset.pattern.permute.xlu1 %v3444_v51 }
  0xd0   : >> { %643 = vperm.xlu1 %2311, %v3490_v28  }
  0xd1   : >> { %663 = vperm.xlu0 %2333, %v2739_v33  }
  0xd4   : >> { %2312 = vset.pattern.permute.xlu1 %v3442_v57 }
  0xd5   : >> { %731 = vperm.xlu1 %2312, %v386_v0   ;;  %671 = vperm.xlu0 %2333, %v2745_v35  }
  0xd9   : >> { %799 = vperm.xlu1 %2312, %v3491_v27   ;;  %604 = vperm.xlu0 %2333, %v2868_v3  }
  0xdd   : >> { %803 = vperm.xlu1 %2312, %v3490_v28   ;;  %679 = vperm.xlu0 %2333, %v2751_v37  }
  0xe1   : >> { %2313 = vset.pattern.permute.xlu1 %v3446_v52  ;;  %2337 = vset.pattern.permute.xlu0 %v3442_v57 }
  0xe2   : >> { %420 = vperm.xlu1 %2313, %v389_v1   ;;  %722 = vperm.xlu0 %2337, %v2779_v54  }
  0xe6   : >> { %2314 = vset.pattern.permute.xlu1 %v3444_v51  ;;  %725 = vperm.xlu0 %2337, %v2787_v55  }
  0xe7   : >> { %577 = vperm.xlu1 %2314, %v2802_v58  }
  0xea   : >> { %795 = vperm.xlu0 %2337, %v3492_v26  }
  0xeb   : >> { %2315 = vset.pattern.permute.xlu1 %v3446_v52 }
  0xec   : >> { %494 = vperm.xlu1 %2315, %v3489_v29  }
  0xee   : >> { %734 = vperm.xlu0 %2337, %v2793_v56  }
  0xf0   : >> { %499 = vperm.xlu1 %2315, %v3488_v30  }
  0xf2   : >> { %737 = vperm.xlu0 %2337, %v2802_v58  }
  0xf4   : >> { %2316 = vset.pattern.permute.xlu1 %v3444_v51 }
  0xf5   : >> { %651 = vperm.xlu1 %2316, %v3488_v30  }
  0xf6   : >> { %811 = vperm.xlu0 %2337, %v3488_v30  }
  0xf9   : >> { %2317 = vset.pattern.permute.xlu1 %v3442_v57 }
  0xfa   : >> { %740 = vperm.xlu1 %2317, %v389_v1   ;;  %746 = vperm.xlu0 %2337, %v2808_v59  }
  0xfb   : >> { %v2893_v39 = vpop.permute.xlu1 %559  ;;  %v400_v40 = vpop.permute.xlu0 %399 }
  0xfc   : >> { %vm446_vm4 = vcmp.eq.s32.totalorder %v400_v40, %v2677_v14  ;;  %vm606_vm5 = vcmp.eq.s32.totalorder %v2893_v39, %v2677_v14 }
  0xfe   : >> { %807 = vperm.xlu1 %2317, %v3489_v29   ;;  %749 = vperm.xlu0 %2337, %v2818_v61  }
  0xff   : >> { %v2897_v41 = vpop.permute.xlu1 %562  ;;  %v2899_v42 = vpop.permute.xlu0 %402 }
 0x100   : >> { %vm607_vm7 = vcmp.eq.s32.totalorder %v2897_v41, %v2677_v14  ;;  %vm447_vm8 = vcmp.eq.s32.totalorder %v2899_v42, %v2677_v14 }
 0x102   : >> { %2318 = vset.pattern.permute.xlu1 %v3446_v52  ;;  %827 = vperm.xlu0 %2337, %v2742_v34  }
 0x103   : >> { %423 = vperm.xlu1 %2318, %v390_v43   ;;  %v465_v44 = vpop.permute.xlu0 %464 }
 0x104   : >> { %v2906_v45 = vpop.permute.xlu1 %469  ;;  %v2908_v46 = vsel %vm446_vm4, %v465_v44, 0.0 }
 0x106   : >> { %758 = vperm.xlu0 %2337, %v2824_v62  }
 0x107   : >> { %2319 = vset.pattern.permute.xlu1 %v3444_v51  ;;  %v2912_v47 = vpop.permute.xlu0 %405 }
 0x108   : >> { %583 = vperm.xlu1 %2319, %v390_v43   ;;  %vm448_vm11 = vcmp.eq.s32.totalorder %v2912_v47, %v2677_v14 }
 0x109   : >> { %v2914_v48 = vpop.permute.xlu1 %627 }
 0x10a   : >> { %761 = vperm.xlu0 %2337, %v2833_v63  }
 0x10b   : >> { %v2917_v53 = vpop.permute.xlu0 %414 }
 0x10c   : >> { %586 = vperm.xlu1 %2319, %v2808_v59   ;;  %vm451_vm2 = vcmp.eq.s32.totalorder %v2917_v53, %v2677_v14 }
 0x10e   : >> { %v2920_v54 = vpop.permute.xlu1 %719  ;;  %843 = vperm.xlu0 %2337, %v2754_v38  }
 0x10f   : >> { %v2923_v55 = vpop.permute.xlu0 %484  ;;  %vm766_vm6 = vcmp.eq.s32.totalorder %v2920_v54, %v2677_v14  ;;  %v687_v54 = vsel %vm607_vm7, %v2914_v48, 0.0 }
 0x110   : >> { %2320 = vset.pattern.permute.xlu1 %v3446_v52 }
 0x111   : >> { %509 = vperm.xlu1 %2320, %v2736_v32  }
 0x112   : >> { %v784_v56 = vpop.permute.xlu1 %783 }
 0x113   : >> { %v2927_v58 = vpop.permute.xlu0 %417  ;;  %v846_v28 = vsel %vm766_vm6, %v784_v56, 0.0 }
 0x114   : >> { %vm452_vm7 = vcmp.eq.s32.totalorder %v2927_v58, %v2677_v14 }
 0x115   : >> { %2321 = vset.pattern.permute.xlu1 %v3444_v51 }
 0x116   : >> { %659 = vperm.xlu1 %2321, %v2736_v32   ;;  %v2931_v60 = vpop.permute.xlu1 %787 }
 0x117   : >> { %v2933_v59 = vpop.permute.xlu0 %426 }
 0x11a   : >> { %2322 = vset.pattern.permute.xlu1 %v3442_v57 }
 0x11b   : >> { %743 = vperm.xlu1 %2322, %v390_v43   ;;  %v2936_v0 = vpop.permute.xlu1 %408  ;;  %v2938_v1 = vpop.permute.xlu0 %504 }
 0x11c   : >> { %vm449_vm0 = vcmp.eq.s32.totalorder %v2936_v0, %v2677_v14 }
 0x11f   : >> { %815 = vperm.xlu1 %2322, %v2733_v31   ;;  %v2941_v40 = vpop.permute.xlu0 %429 }
 0x120   : >> { %v2943_v44 = vpop.permute.xlu1 %565 }
 0x121   : >> { %vm608_vm13 = vcmp.eq.s32.totalorder %v2943_v44, %v2677_v14 }
 0x123   : >> { %819 = vperm.xlu1 %2322, %v2736_v32   ;;  %v2946_v4 = vpop.permute.xlu0 %438 }
 0x125   : >> { %v2948_v7 = vpop.permute.xlu1 %474 }
 0x127   : >> { %2323 = vset.pattern.permute.xlu1 %v3446_v52  ;;  %v2951_v57 = vpop.permute.xlu0 %524 }
 0x128   : >> { %432 = vperm.xlu1 %2323, %v2856_v2  }
 0x129   : >> { %v2954_v43 = vpop.permute.xlu1 %479 }
 0x12b   : >> { %v2956_v51 = vpop.permute.xlu0 %441 }
 0x12c   : >> { %2324 = vset.pattern.permute.xlu1 %v3511_v5 }
 0x12d   : >> { %589 = vperm.xlu1 %2324, %v2818_v61  }
 0x12e   : >> { %v2960_v6 = vpop.permute.xlu1 %635 }
 0x130   : >> { %v624_v8 = vpop.permute.xlu0 %623 }
 0x131   : >> { %2325 = vset.pattern.permute.xlu1 %v3446_v52  ;;  %v686_v50 = vsel %vm606_vm5, %v624_v8, 0.0 }
 0x132   : >> { %514 = vperm.xlu1 %2325, %v2739_v33   ;;  %v702_v27 = vadd.f32 %v686_v50, %v2908_v46 }
 0x133   : >> { %v2964_v9 = vpop.permute.xlu1 %728 }
 0x134   : >> { %v2966_v10 = vpop.permute.xlu0 %568  ;;  %v862_v39 = vadd.f32 %v846_v28, %v702_v27  ;;  %v543_v27 = vsel %vm447_vm8, %v2906_v45, 0.0  ;;  %vm769_vm3 = vcmp.eq.s32.totalorder %v2964_v9, %v2677_v14 }
 0x135   : >> { %v703_v56 = vadd.f32 %v687_v54, %v543_v27  ;;  %vm609_vm15 = vcmp.eq.s32.totalorder %v2966_v10, %v2677_v14 }
 0x136   : >> { %519 = vperm.xlu1 %2325, %v2742_v34   ;;  %v879_v46 = vand.u32 4294901760, %v862_v39 }
 0x137   : >> { %v2969_v11 = vpop.permute.xlu1 %791 }
 0x138   : >> { %v632_v12 = vpop.permute.xlu0 %631  ;;  %v3025_v41 = vsub.f32 %v862_v39, %v879_v46 }
 0x139   : >> { %v688_v48 = vsel %vm608_vm13, %v632_v12, 0.0  ;;  %v689_v12 = vsel %vm609_vm15, %v2960_v6, 0.0 }
 0x13a   : >> { %2326 = vset.pattern.permute.xlu1 %v3511_v5  ;;  %v972_v10 = vand.u32 4294901760, %v3025_v41 }
 0x13b   : >> { %667 = vperm.xlu1 %2326, %v2742_v34  }
 0x13c   : >> { %v412_v61 = vpop.permute.xlu1 %411  ;;  %v640_v13 = vpop.permute.xlu0 %639 }
 0x13d   : >> { %vm450_vm10 = vcmp.eq.s32.totalorder %v412_v61, %v2677_v14 }
 0x13e   : >> { %v546_v45 = vsel %vm450_vm10, %v2923_v55, 0.0 }
 0x13f   : >> { %2327 = vset.pattern.permute.xlu1 %v3512_v15 }
 0x140   : >> { %752 = vperm.xlu1 %2327, %v2856_v2   ;;  %v2975_v52 = vpop.permute.xlu0 %580 }
 0x141   : >> { %v572_v16 = vpop.permute.xlu1 %571  ;;  %vm613_vm6 = vcmp.eq.s32.totalorder %v2975_v52, %v2677_v14 }
 0x142   : >> { %vm610_vm9 = vcmp.eq.s32.totalorder %v572_v16, %v2677_v14 }
 0x143   : >> { %v690_v28 = vsel %vm610_vm9, %v640_v13, 0.0 }
 0x144   : >> { %823 = vperm.xlu1 %2327, %v2739_v33   ;;  %v2978_v17 = vpop.permute.xlu0 %647  ;;  %v706_v61 = vadd.f32 %v690_v28, %v546_v45 }
 0x145   : >> { %v2980_v18 = vpop.permute.xlu1 %574 }
 0x146   : >> { %vm611_vm4 = vcmp.eq.s32.totalorder %v2980_v18, %v2677_v14 }
 0x148   : >> { %2328 = vset.pattern.permute.xlu1 %v3514_v21  ;;  %v2985_v22 = vpop.permute.xlu0 %655 }
 0x149   : >> { %435 = vperm.xlu1 %2328, %v394_v20  }
 0x14a   : >> { %v2987_v23 = vpop.permute.xlu1 %489 }
 0x14c   : >> { %v2989_v2 = vpop.permute.xlu0 %592 }
 0x14d   : >> { %2329 = vset.pattern.permute.xlu1 %v3511_v5 }
 0x14e   : >> { %595 = vperm.xlu1 %2329, %v394_v20  }
 0x14f   : >> { %v2992_v24 = vpop.permute.xlu1 %643 }
 0x150   : >> { %v2994_v25 = vpop.permute.xlu0 %663  ;;  %v691_v45 = vsel %vm611_vm4, %v2992_v24, 0.0 }
 0x152   : >> { %598 = vperm.xlu1 %2329, %v2824_v62  }
 0x154   : >> { %v732_v19 = vpop.permute.xlu1 %731  ;;  %v2999_v26 = vpop.permute.xlu0 %671 }
 0x155   : >> { %vm770_vm12 = vcmp.eq.s32.totalorder %v732_v19, %v2677_v14 }
 0x156   : >> { %2330 = vset.pattern.permute.xlu1 %v3514_v21 }
 0x157   : >> { %529 = vperm.xlu1 %2330, %v2748_v36  }
 0x158   : >> { %v800_v29 = vpop.permute.xlu1 %799  ;;  %v3006_v30 = vpop.permute.xlu0 %604 }
 0x159   : >> { %v850_v13 = vsel %vm770_vm12, %v800_v29, 0.0  ;;  %vm2499_vm12 = vmmov 0  }
 0x15a   : >> { %v3043_v55 = vadd.f32 %v850_v13, %v706_v61 }
 0x15b   : >> { %2331 = vset.pattern.permute.xlu1 %v3511_v5 }
 0x15c   : >> { %675 = vperm.xlu1 %2331, %v2748_v36   ;;  %v3010_v8 = vpop.permute.xlu1 %803  ;;  %v3012_v62 = vpop.permute.xlu0 %679  ;;  %v891_v28 = vand.u32 4294901760, %v3043_v55 }
 0x160   : >> { %2332 = vset.pattern.permute.xlu1 %v3512_v15 }
 0x161   : >> { %755 = vperm.xlu1 %2332, %v394_v20   ;;  %v3028_v42 = vpop.permute.xlu1 %420  ;;  %v723_v16 = vpop.permute.xlu0 %722  ;;  %v544_v20 = vsel %vm448_vm11, %v2948_v7, 0.0  ;;  %v545_v7 = vsel %vm449_vm0, %v2954_v43, 0.0  ;;  %v973_v43 = vsub.f32 %v3025_v41, %v972_v10 }
 0x162   : >> { %vm767_vm14 = vcmp.eq.s32.totalorder %v723_v16, %v2677_v14  ;;  %v704_v44 = vadd.f32 %v688_v48, %v544_v20  ;;  %v705_v27 = vadd.f32 %v689_v12, %v545_v7  ;;  %v3515_v48 = vmov 0.0|0.0  }
 0x163   : >> { %v847_v50 = vsel %vm767_vm14, %v2931_v60, 0.0  ;;  %v547_v20 = vsel %vm451_vm2, %v2987_v23, 0.0  ;;  %vm453_vm8 = vcmp.eq.s32.totalorder %v3028_v42, %v2677_v14 }
 0x164   : >> { %v863_v19 = vadd.f32 %v847_v50, %v703_v56 }
 0x165   : >> { %831 = vperm.xlu1 %2332, %v2745_v35   ;;  %v726_v29 = vpop.permute.xlu0 %725 }
 0x166   : >> { %v882_v60 = vand.u32 4294901760, %v863_v19  ;;  %vm768_vm1 = vcmp.eq.s32.totalorder %v726_v29, %v2677_v14  ;;  %v3049_v39 = vpop.permute.xlu1 %577  ;;  %v3082_v29 = vsub.f32 %v3043_v55, %v891_v28 }
 0x167   : >> { %v848_v47 = vsel %vm768_vm1, %v2969_v11, 0.0  ;;  %vm612_vm9 = vcmp.eq.s32.totalorder %v3049_v39, %v2677_v14  ;;  %vm455_vm1 = vcmp.eq.s32.totalorder %v2933_v59, %v2677_v14 }
 0x168   : >> { %v3057_v0 = vsub.f32 %v863_v19, %v882_v60  ;;  %v864_v54 = vadd.f32 %v848_v47, %v704_v44  ;;  %v3059_v6 = vpack.c.bf16 %v882_v60, %v879_v46  ;;  %v974_v44 = vand.u32 4294901760, %v973_v43 }
 0x169   : >> { %835 = vperm.xlu1 %2332, %v2748_v36   ;;  %v796_v56 = vpop.permute.xlu0 %795  ;;  %v707_v60 = vadd.f32 %v691_v45, %v547_v20 }
 0x16a   : >> { %v885_v11 = vand.u32 4294901760, %v864_v54  ;;  %v849_v16 = vsel %vm769_vm3, %v796_v56, 0.0  ;;  %2045 = vmatpush3.bf16.msra.mxu0 %v3059_v6  ;;  %v979_v9 = vand.u32 4294901760, %v3057_v0  ;;  %v2092_v46 = vpack.c.bf16 %v3057_v0, %v3025_v41 }
 0x16b   : >> { %v865_v13 = vadd.f32 %v849_v16, %v705_v27  ;;  %v495_v18 = vpop.permute.xlu1 %494  ;;  %2046 = vmatprep.subr.bf16.mxu0 %v3515_v48  ;;  %v1000_v56 = vand.u32 4294901760, %v3082_v29  ;;  %vm617_vm3 = vcmp.eq.s32.totalorder %v2989_v2, %v2677_v14 }
 0x16c   : >> { %v3072_v61 = vsub.f32 %v864_v54, %v885_v11  ;;  %v980_v50 = vsub.f32 %v3057_v0, %v979_v9  ;;  %v3075_v19 = vpack.c.bf16 %v979_v9, %v972_v10 }
 0x16d   : >> { %v888_v12 = vand.u32 4294901760, %v865_v13  ;;  %2334 = vset.pattern.permute.xlu1 %v3514_v21  ;;  %v735_v24 = vpop.permute.xlu0 %734 }
 0x16e   : >> { %vm771_vm5 = vcmp.eq.s32.totalorder %v735_v24, %v2677_v14  ;;  %444 = vperm.xlu1 %2334, %v2868_v3   ;;  %v981_v10 = vand.u32 4294901760, %v980_v50  ;;  %v986_v7 = vand.u32 4294901760, %v3072_v61 }
 0x16f   : >> { %v3088_v47 = vsub.f32 %v865_v13, %v888_v12  ;;  %v851_v23 = vsel %vm771_vm5, %v3010_v8, 0.0  ;;  %v500_v53 = vpop.permute.xlu1 %499  ;;  %v3091_v55 = vpack.c.bf16 %v888_v12, %v885_v11  ;;  %vm456_vm5 = vcmp.eq.s32.totalorder %v2941_v40, %v2677_v14 }
 0x170   : >> { %v867_v54 = vadd.f32 %v851_v23, %v707_v60  ;;  %v2068_v27 = vpack.c.bf16 %v981_v10, %v974_v44  ;;  %v987_v16 = vsub.f32 %v3072_v61, %v986_v7  ;;  %v549_v58 = vsel %vm453_vm8, %v500_v53, 0.0 }
 0x171   : >> { %v993_v43 = vand.u32 4294901760, %v3088_v47  ;;  %2048 = vmatpush3.bf16.msra.mxu0 %v3091_v55  ;;  %v2095_v9 = vpack.c.bf16 %v3088_v47, %v3072_v61  ;;  %v738_v8 = vpop.permute.xlu0 %737 }
 0x172   : >> { %v894_v45 = vand.u32 4294901760, %v867_v54  ;;  %2335 = vset.pattern.permute.xlu1 %v3511_v5  ;;  %2069 = vmatpush3.bf16.msra.mxu1 %v2068_v27  ;;  %v988_v24 = vand.u32 4294901760, %v987_v16  ;;  %vm772_vm11 = vcmp.eq.s32.totalorder %v738_v8, %v2677_v14 }
 0x173   : >> { %601 = vperm.xlu1 %2335, %v2833_v63   ;;  %2049 = vmatprep.subr.bf16.mxu0 %v3515_v48  ;;  %v994_v11 = vsub.f32 %v3088_v47, %v993_v43  ;;  %v3103_v13 = vpack.c.bf16 %v993_v43, %v986_v7  ;;  %v1001_v63 = vsub.f32 %v3082_v29, %v1000_v56  ;;  %v548_v43 = vsel %vm452_vm7, %v495_v18, 0.0 }
 0x174   : >> { %v3107_v50 = vsub.f32 %v867_v54, %v894_v45  ;;  %v652_v20 = vpop.permute.xlu1 %651  ;;  %v3109_v12 = vpack.c.bf16 %v894_v45, %v891_v28  ;;  %2070 = vmatprep.subr.bf16.mxu1 %v3515_v48 }
 0x175   : >> { %v995_v44 = vand.u32 4294901760, %v994_v11  ;;  %v693_v52 = vsel %vm613_vm6, %v652_v20, 0.0  ;;  %v812_v7 = vpop.permute.xlu0 %811 }
 0x176   : >> { %2051 = vmatpush3.bf16.msra.mxu0 %v3109_v12  ;;  %v1007_v60 = vand.u32 4294901760, %v3107_v50  ;;  %v2098_v10 = vpack.c.bf16 %v3107_v50, %v3082_v29  ;;  %v709_v16 = vadd.f32 %v693_v52, %v549_v58 }
 0x177   : >> { %2336 = vset.pattern.permute.xlu1 %v3514_v21  ;;  %v2071_v28 = vpack.c.bf16 %v995_v44, %v988_v24  ;;  %2052 = vmatprep.subr.bf16.mxu0 %v3515_v48  ;;  %v1002_v21 = vand.u32 4294901760, %v1001_v63 }
 0x178   : >> { %534 = vperm.xlu1 %2336, %v2751_v37   ;;  %v1008_v23 = vsub.f32 %v3107_v50, %v1007_v60  ;;  %v3125_v54 = vpack.c.bf16 %v1007_v60, %v1000_v56  ;;  %v692_v56 = vsel %vm612_vm9, %v2978_v17, 0.0 }
 0x179   : >> { %v741_v27 = vpop.permute.xlu1 %740  ;;  %2072 = vmatpush3.bf16.msra.mxu1 %v2071_v28  ;;  %v708_v53 = vadd.f32 %v692_v56, %v548_v43  ;;  %v2500_v56 = vmov 0.0  }
 0x17a   : >> { %vm773_vm10 = vcmp.eq.s32.totalorder %v741_v27, %v2677_v14  ;;  %2073 = vmatprep.subr.bf16.mxu1 %v3515_v48  ;;  %v1009_v42 = vand.u32 4294901760, %v1008_v23  ;;  %1865 = vmatprep.mubr.msk.f32.mxu0 %vm2499_vm12, %v2500_v56 }
 0x17b   : >> { %v853_v45 = vsel %vm773_vm10, %v812_v7, 0.0  ;;  %1900 = vmatprep.mubr.msk.f32.mxu1 %vm2499_vm12, %v2500_v56 }
 0x17c   : >> { %v869_v11 = vadd.f32 %v853_v45, %v709_v16  ;;  %539 = vperm.xlu1 %2336, %v2754_v38   ;;  %v2074_v39 = vpack.c.bf16 %v1009_v42, %v1002_v21 }
 0x17d   : >> { %v808_v20 = vpop.permute.xlu1 %807 }
 0x17e   : >> { %v900_v24 = vand.u32 4294901760, %v869_v11  ;;  %v852_v44 = vsel %vm772_vm11, %v808_v20, 0.0  ;;  %2075 = vmatpush3.bf16.msra.mxu1 %v2074_v39  ;;  %v747_v20 = vpop.permute.xlu0 %746 }
 0x17f   : >> { %v868_v18 = vadd.f32 %v852_v44, %v708_v53  ;;  %2076 = vmatprep.subr.bf16.mxu1 %v3515_v48  ;;  %vm775_vm2 = vcmp.eq.s32.totalorder %v747_v20, %v2677_v14 }
 0x180   : >> { %v3135_v63 = vsub.f32 %v869_v11, %v900_v24  ;;  %2338 = vset.pattern.permute.xlu1 %v3511_v5 }
 0x181   : >> { %v897_v8 = vand.u32 4294901760, %v868_v18  ;;  %683 = vperm.xlu1 %2338, %v2754_v38  }
 0x182   : >> { %v1021_v17 = vand.u32 4294901760, %v3135_v63  ;;  %v424_v60 = vpop.permute.xlu1 %423 }
 0x183   : >> { %v3140_v52 = vsub.f32 %v868_v18, %v897_v8  ;;  %v3142_v28 = vpack.c.bf16 %v900_v24, %v897_v8  ;;  %vm454_vm14 = vcmp.eq.s32.totalorder %v424_v60, %v2677_v14 }
 0x184   : >> { %v1022_v23 = vsub.f32 %v3135_v63, %v1021_v17  ;;  %v550_v53 = vsel %vm454_vm14, %v2938_v1, 0.0  ;;  %vm459_vm14 = vcmp.eq.s32.totalorder %v2946_v4, %v2677_v14 }
 0x185   : >> { %v1014_v7 = vand.u32 4294901760, %v3140_v52  ;;  %2339 = vset.pattern.permute.xlu1 %v3512_v15  ;;  %2054 = vmatpush3.bf16.msra.mxu0 %v3142_v28  ;;  %v3516_v41 = vpack.c.bf16 %v3135_v63, %v3140_v52 }
 0x186   : >> { %764 = vperm.xlu1 %2339, %v2868_v3   ;;  %2055 = vmatprep.subr.bf16.mxu0 %v3515_v48  ;;  %v1023_v16 = vand.u32 4294901760, %v1022_v23 }
 0x187   : >> { %v584_v58 = vpop.permute.xlu1 %583  ;;  %v1015_v27 = vsub.f32 %v3140_v52, %v1014_v7  ;;  %v3153_v21 = vpack.c.bf16 %v1021_v17, %v1014_v7 }
 0x188   : >> { %vm614_vm13 = vcmp.eq.s32.totalorder %v584_v58, %v2677_v14 }
 0x189   : >> { %v1016_v43 = vand.u32 4294901760, %v1015_v27  ;;  %v694_v39 = vsel %vm614_vm13, %v2985_v22, 0.0 }
 0x18a   : >> { %839 = vperm.xlu1 %2339, %v2751_v37   ;;  %v710_v24 = vadd.f32 %v694_v39, %v550_v53 }
 0x18b   : >> { %v587_v15 = vpop.permute.xlu1 %586  ;;  %v2077_v42 = vpack.c.bf16 %v1023_v16, %v1016_v43 }
 0x18c   : >> { %vm615_vm15 = vcmp.eq.s32.totalorder %v587_v15, %v2677_v14 }
 0x18d   : >> { %2078 = vmatpush3.bf16.msra.mxu1 %v2077_v42 }
 0x18e   : >> { %2079 = vmatprep.subr.bf16.mxu1 %v3515_v48 }
 0x190   : >> { %v510_v45 = vpop.permute.xlu1 %509 }
 0x191   : >> { %v551_v60 = vsel %vm455_vm1, %v510_v45, 0.0 }
 0x195   : >> { %v660_v3 = vpop.permute.xlu1 %659 }
 0x196   : >> { %v695_v18 = vsel %vm615_vm15, %v660_v3, 0.0 }
 0x197   : >> { %v711_v7 = vadd.f32 %v695_v18, %v551_v60  ;;  %v750_v60 = vpop.permute.xlu0 %749 }
 0x198   : >> { %vm776_vm8 = vcmp.eq.s32.totalorder %v750_v60, %v2677_v14 }
 0x19a   : >> { %v744_v11 = vpop.permute.xlu1 %743 }
 0x19b   : >> { %vm774_vm0 = vcmp.eq.s32.totalorder %v744_v11, %v2677_v14 }
 0x19e   : >> { %v816_v44 = vpop.permute.xlu1 %815 }
 0x19f   : >> { %v854_v8 = vsel %vm774_vm0, %v816_v44, 0.0  ;;  %vm621_vm0 = vcmp.eq.s32.totalorder %v3006_v30, %v2677_v14 }
 0x1a0   : >> { %v870_v17 = vadd.f32 %v854_v8, %v710_v24 }
 0x1a2   : >> { %v903_v22 = vand.u32 4294901760, %v870_v17  ;;  %v820_v23 = vpop.permute.xlu1 %819 }
 0x1a3   : >> { %v855_v1 = vsel %vm775_vm2, %v820_v23, 0.0  ;;  %v828_v23 = vpop.permute.xlu0 %827  ;;  %vm460_vm2 = vcmp.eq.s32.totalorder %v2956_v51, %v2677_v14 }
 0x1a4   : >> { %v3170_v58 = vsub.f32 %v870_v17, %v903_v22  ;;  %v871_v27 = vadd.f32 %v855_v1, %v711_v7 }
 0x1a6   : >> { %v1028_v43 = vand.u32 4294901760, %v3170_v58  ;;  %v906_v16 = vand.u32 4294901760, %v871_v27 }
 0x1a7   : >> { %v433_v15 = vpop.permute.xlu1 %432 }
 0x1a8   : >> { %v3173_v42 = vsub.f32 %v871_v27, %v906_v16  ;;  %v3175_v3 = vpack.c.bf16 %v906_v16, %v903_v22  ;;  %v1029_v45 = vsub.f32 %v3170_v58, %v1028_v43  ;;  %vm457_vm4 = vcmp.eq.s32.totalorder %v433_v15, %v2677_v14 }
 0x1aa   : >> { %v1035_v59 = vand.u32 4294901760, %v3173_v42  ;;  %2057 = vmatpush3.bf16.msra.mxu0 %v3175_v3  ;;  %v1030_v24 = vand.u32 4294901760, %v1029_v45  ;;  %v3517_v0 = vpack.c.bf16 %v3173_v42, %v3170_v58 }
 0x1ab   : >> { %2058 = vmatprep.subr.bf16.mxu0 %v3515_v48 }
 0x1ac   : >> { %v590_v39 = vpop.permute.xlu1 %589  ;;  %v1036_v53 = vsub.f32 %v3173_v42, %v1035_v59  ;;  %v3184_v20 = vpack.c.bf16 %v1035_v59, %v1028_v43 }
 0x1ad   : >> { %vm616_vm6 = vcmp.eq.s32.totalorder %v590_v39, %v2677_v14 }
 0x1ae   : >> { %v1037_v44 = vand.u32 4294901760, %v1036_v53  ;;  %v696_v2 = vsel %vm616_vm6, %v2994_v25, 0.0 }
 0x1b0   : >> { %v2080_v18 = vpack.c.bf16 %v1037_v44, %v1030_v24 }
 0x1b1   : >> { %v515_v8 = vpop.permute.xlu1 %514 }
 0x1b2   : >> { %2081 = vmatpush3.bf16.msra.mxu1 %v2080_v18  ;;  %v552_v43 = vsel %vm456_vm5, %v515_v8, 0.0 }
 0x1b3   : >> { %2082 = vmatprep.subr.bf16.mxu1 %v3515_v48  ;;  %v712_v53 = vadd.f32 %v696_v2, %v552_v43 }
 0x1b5   : >> { %v520_v17 = vpop.permute.xlu1 %519 }
 0x1b6   : >> { %v553_v1 = vsel %vm457_vm4, %v520_v17, 0.0 }
 0x1ba   : >> { %v668_v7 = vpop.permute.xlu1 %667 }
 0x1bb   : >> { %v697_v22 = vsel %vm617_vm3, %v668_v7, 0.0 }
 0x1bc   : >> { %v713_v16 = vadd.f32 %v697_v22, %v553_v1 }
 0x1bf   : >> { %v753_v27 = vpop.permute.xlu1 %752 }
 0x1c0   : >> { %vm777_vm7 = vcmp.eq.s32.totalorder %v753_v27, %v2677_v14 }
 0x1c1   : >> { %v857_v59 = vsel %vm777_vm7, %v828_v23, 0.0 }
 0x1c2   : >> { %v873_v45 = vadd.f32 %v857_v59, %v713_v16 }
 0x1c3   : >> { %v824_v15 = vpop.permute.xlu1 %823 }
 0x1c4   : >> { %v912_v24 = vand.u32 4294901760, %v873_v45  ;;  %v856_v44 = vsel %vm776_vm8, %v824_v15, 0.0 }
 0x1c5   : >> { %v872_v18 = vadd.f32 %v856_v44, %v712_v53 }
 0x1c6   : >> { %v3196_v40 = vsub.f32 %v873_v45, %v912_v24 }
 0x1c7   : >> { %v909_v39 = vand.u32 4294901760, %v872_v18 }
 0x1c8   : >> { %v1049_v17 = vand.u32 4294901760, %v3196_v40  ;;  %v436_v8 = vpop.permute.xlu1 %435 }
 0x1c9   : >> { %v3199_v7 = vsub.f32 %v872_v18, %v909_v39  ;;  %v3201_v22 = vpack.c.bf16 %v912_v24, %v909_v39  ;;  %vm458_vm10 = vcmp.eq.s32.totalorder %v436_v8, %v2677_v14 }
 0x1ca   : >> { %v1050_v25 = vsub.f32 %v3196_v40, %v1049_v17  ;;  %v554_v18 = vsel %vm458_vm10, %v2951_v57, 0.0 }
 0x1cb   : >> { %v1042_v60 = vand.u32 4294901760, %v3199_v7  ;;  %2060 = vmatpush3.bf16.msra.mxu0 %v3201_v22 }
 0x1cc   : >> { %2061 = vmatprep.subr.bf16.mxu0 %v3515_v48  ;;  %v1051_v59 = vand.u32 4294901760, %v1050_v25 }
 0x1cd   : >> { %v596_v1 = vpop.permute.xlu1 %595  ;;  %v1043_v27 = vsub.f32 %v3199_v7, %v1042_v60  ;;  %v3210_v43 = vpack.c.bf16 %v1049_v17, %v1042_v60 }
 0x1ce   : >> { %vm618_vm9 = vcmp.eq.s32.totalorder %v596_v1, %v2677_v14  ;;  %v759_v1 = vpop.permute.xlu0 %758 }
 0x1cf   : >> { %v1044_v16 = vand.u32 4294901760, %v1043_v27  ;;  %v698_v44 = vsel %vm618_vm9, %v2999_v26, 0.0  ;;  %vm779_vm15 = vcmp.eq.s32.totalorder %v759_v1, %v2677_v14 }
 0x1d0   : >> { %v714_v39 = vadd.f32 %v698_v44, %v554_v18 }
 0x1d1   : >> { %v599_v2 = vpop.permute.xlu1 %598  ;;  %v2083_v45 = vpack.c.bf16 %v1051_v59, %v1044_v16 }
 0x1d2   : >> { %vm619_vm11 = vcmp.eq.s32.totalorder %v599_v2, %v2677_v14 }
 0x1d3   : >> { %2084 = vmatpush3.bf16.msra.mxu1 %v2083_v45 }
 0x1d4   : >> { %2085 = vmatprep.subr.bf16.mxu1 %v3515_v48 }
 0x1d6   : >> { %v530_v53 = vpop.permute.xlu1 %529 }
 0x1d7   : >> { %v555_v16 = vsel %vm459_vm14, %v530_v53, 0.0 }
 0x1db   : >> { %v676_v15 = vpop.permute.xlu1 %675 }
 0x1dc   : >> { %v699_v60 = vsel %vm619_vm11, %v676_v15, 0.0 }
 0x1dd   : >> { %v715_v8 = vadd.f32 %v699_v60, %v555_v16 }
 0x1e0   : >> { %v756_v24 = vpop.permute.xlu1 %755 }
 0x1e1   : >> { %vm778_vm13 = vcmp.eq.s32.totalorder %v756_v24, %v2677_v14 }
 0x1e4   : >> { %v832_v17 = vpop.permute.xlu1 %831 }
 0x1e5   : >> { %v858_v25 = vsel %vm778_vm13, %v832_v17, 0.0 }
 0x1e6   : >> { %v874_v27 = vadd.f32 %v858_v25, %v714_v39 }
 0x1e8   : >> { %v915_v26 = vand.u32 4294901760, %v874_v27  ;;  %v836_v59 = vpop.permute.xlu1 %835 }
 0x1e9   : >> { %v859_v57 = vsel %vm779_vm15, %v836_v59, 0.0  ;;  %v762_v59 = vpop.permute.xlu0 %761 }
 0x1ea   : >> { %v3222_v45 = vsub.f32 %v874_v27, %v915_v26  ;;  %v875_v2 = vadd.f32 %v859_v57, %v715_v8  ;;  %vm780_vm5 = vcmp.eq.s32.totalorder %v762_v59, %v2677_v14 }
 0x1ec   : >> { %v1056_v24 = vand.u32 4294901760, %v3222_v45  ;;  %v918_v44 = vand.u32 4294901760, %v875_v2 }
 0x1ed   : >> { %v445_v15 = vpop.permute.xlu1 %444 }
 0x1ee   : >> { %v3225_v18 = vsub.f32 %v875_v2, %v918_v44  ;;  %v3227_v17 = vpack.c.bf16 %v918_v44, %v915_v26  ;;  %v1057_v53 = vsub.f32 %v3222_v45, %v1056_v24  ;;  %v3238_v2 = vand.u32 4294901760, %v2757_v49 }
 0x1ef   : >> { %vm461_vm1 = vcmp.eq.s32.totalorder %v445_v15, %v2677_v14 }
 0x1f0   : >> { %v1063_v4 = vand.u32 4294901760, %v3225_v18  ;;  %2063 = vmatpush3.bf16.msra.mxu0 %v3227_v17  ;;  %v1058_v27 = vand.u32 4294901760, %v1057_v53  ;;  %v2110_v61 = vpack.c.bf16 %v3225_v18, %v3222_v45 }
 0x1f1   : >> { %2064 = vmatprep.subr.bf16.mxu0 %v3515_v48 }
 0x1f2   : >> { %v602_v39 = vpop.permute.xlu1 %601  ;;  %v1064_v60 = vsub.f32 %v3225_v18, %v1063_v4  ;;  %v3234_v25 = vpack.c.bf16 %v1063_v4, %v1056_v24  ;;  %v3245_v24 = vsub.f32 %v2757_v49, %v3238_v2 }
 0x1f3   : >> { %vm620_vm3 = vcmp.eq.s32.totalorder %v602_v39, %v2677_v14 }
 0x1f4   : >> { %v1065_v1 = vand.u32 4294901760, %v1064_v60  ;;  %v844_v60 = vpop.permute.xlu0 %843 }
 0x1f6   : >> { %v2086_v16 = vpack.c.bf16 %v1065_v1, %v1058_v27 }
 0x1f7   : >> { %v535_v8 = vpop.permute.xlu1 %534 }
 0x1f8   : >> { %2087 = vmatpush3.bf16.msra.mxu1 %v2086_v16  ;;  %v556_v27 = vsel %vm460_vm2, %v535_v8, 0.0  ;;  %v700_v16 = vsel %vm620_vm3, %v3012_v62, 0.0 }
 0x1f9   : >> { %2088 = vmatprep.subr.bf16.mxu1 %v3515_v48  ;;  %v716_v23 = vadd.f32 %v700_v16, %v556_v27 }
 0x1fb   : >> { %v540_v26 = vpop.permute.xlu1 %539 }
 0x1fc   : >> { %v557_v4 = vsel %vm461_vm1, %v540_v26, 0.0 }
 0x200   : >> { %v684_v57 = vpop.permute.xlu1 %683 }
 0x201   : >> { %v701_v44 = vsel %vm621_vm0, %v684_v57, 0.0  ;;  %v961_v57 = vand.u32 4294901760, %v3245_v24 }
 0x202   : >> { %v717_v1 = vadd.f32 %v701_v44, %v557_v4 }
 0x203   : >> { %v962_v8 = vsub.f32 %v3245_v24, %v961_v57 }
 0x205   : >> { %v765_v53 = vpop.permute.xlu1 %764  ;;  %v963_v62 = vand.u32 4294901760, %v962_v8 }
 0x206   : >> { %vm781_vm4 = vcmp.eq.s32.totalorder %v765_v53, %v2677_v14 }
 0x207   : >> { %v861_v30 = vsel %vm781_vm4, %v844_v60, 0.0 }
 0x208   : >> { %v877_v15 = vadd.f32 %v861_v30, %v717_v1 }
 0x209   : >> { %v840_v11 = vpop.permute.xlu1 %839 }
 0x20a   : >> { %v924_v51 = vand.u32 4294901760, %v877_v15  ;;  %v860_v5 = vsel %vm780_vm5, %v840_v11, 0.0 }
 0x20b   : >> { %v876_v39 = vadd.f32 %v860_v5, %v716_v23 }
 0x20c   : >> { %v1076_v26 = vsub.f32 %v877_v15, %v924_v51 }
 0x20d   : >> { %v921_v44 = vand.u32 4294901760, %v876_v39 }
 0x20e   : >> { %v1077_v4 = vand.u32 4294901760, %v1076_v26 }
 0x20f   : >> { %v1069_v53 = vsub.f32 %v876_v39, %v921_v44  ;;  %v3257_v60 = vpack.c.bf16 %v924_v51, %v921_v44 }
 0x210   : >> { %v1078_v59 = vsub.f32 %v1076_v26, %v1077_v4 }
 0x211   : >> { %v1070_v1 = vand.u32 4294901760, %v1069_v53  ;;  %2066 = vmatpush3.bf16.msra.mxu0 %v3257_v60  ;;  %v2113_v27 = vpack.c.bf16 %v1076_v26, %v1069_v53 }
 0x212   : >> { %2091 = vmatprep.subr.bf16.mxu0 %v3515_v48  ;;  %v1079_v30 = vand.u32 4294901760, %v1078_v59 }
 0x213   : >> { %v1071_v11 = vsub.f32 %v1069_v53, %v1070_v1  ;;  %v3261_v5 = vpack.c.bf16 %v1077_v4, %v1070_v1 }
 0x214   : >> { %1866 = vmatmul.mubr.f32.vlgmr.msra.gmra.mrb[0].mxu0 %v963_v62 }
 0x215   : >> { %2093 = vmatpush3.bf16.msra.mxu0 %v2092_v46  ;;  %v1072_v23 = vand.u32 4294901760, %v1071_v11  ;;  %1935 = vmatprep.mubr.msk.f32.mxu0 %vm2499_vm12, %v2500_v56  ;;  %v3518_v46 = vpack.c.bf16 %v3196_v40, %v3199_v7 }
 0x216   : >> { %2094 = vmatprep.subr.bf16.mxu0 %v3515_v48 }
 0x217   : >> { %v2089_v16 = vpack.c.bf16 %v1079_v30, %v1072_v23 }
 0x219   : >> { %2090 = vmatpush3.bf16.msra.mxu1 %v2089_v16  ;;  %2096 = vmatpush3.bf16.msra.mxu0 %v2095_v9 }
 0x21a   : >> { %2097 = vmatprep.subr.bf16.mxu0 %v3515_v48  ;;  %2115 = vmatprep.subr.bf16.mxu1 %v3515_v48 }
 0x21c   : >> { %1901 = vmatmul.mubr.f32.vlgmr.msra.gmra.mrb[0].mxu1 %v3238_v2 }
 0x21d   : >> { %2099 = vmatpush3.bf16.msra.mxu0 %v2098_v10  ;;  %2117 = vmatpush3.bf16.msra.mxu1 %v3059_v6 }
 0x21e   : >> { %2100 = vmatprep.subr.bf16.mxu0 %v3515_v48  ;;  %2118 = vmatprep.subr.bf16.mxu1 %v3515_v48 }
 0x21f   : >> { %1970 = vmatprep.mubr.msk.f32.mxu1 %vm2499_vm12, %v2500_v56 }
 0x221   : >> { %2102 = vmatpush3.bf16.msra.mxu0 %v3516_v41  ;;  %2120 = vmatpush3.bf16.msra.mxu1 %v3091_v55 }
 0x222   : >> { %2103 = vmatprep.subr.bf16.mxu0 %v3515_v48  ;;  %2121 = vmatprep.subr.bf16.mxu1 %v3515_v48 }
 0x225   : >> { %2105 = vmatpush3.bf16.msra.mxu0 %v3517_v0  ;;  %2123 = vmatpush3.bf16.msra.mxu1 %v3109_v12 }
 0x226   : >> { %2106 = vmatprep.subr.bf16.mxu0 %v3515_v48  ;;  %2124 = vmatprep.subr.bf16.mxu1 %v3515_v48 }
 0x229   : >> { %2108 = vmatpush3.bf16.msra.mxu0 %v3518_v46  ;;  %2126 = vmatpush3.bf16.msra.mxu1 %v3142_v28 }
 0x22a   : >> { %2109 = vmatprep.subr.bf16.mxu0 %v3515_v48  ;;  %2127 = vmatprep.subr.bf16.mxu1 %v3515_v48 }
 0x22d   : >> { %2111 = vmatpush3.bf16.msra.mxu0 %v2110_v61  ;;  %2129 = vmatpush3.bf16.msra.mxu1 %v3175_v3 }
 0x22e   : >> { %2112 = vmatprep.subr.bf16.mxu0 %v3515_v48  ;;  %2130 = vmatprep.subr.bf16.mxu1 %v3515_v48 }
 0x231   : >> { %2114 = vmatpush3.bf16.msra.mxu0 %v2113_v27  ;;  %2132 = vmatpush3.bf16.msra.mxu1 %v3201_v22 }
 0x232   : >> { %2133 = vmatprep.subr.bf16.mxu1 %v3515_v48  ;;  %2139 = vmatprep.subr.bf16.mxu0 %v3515_v48 }
 0x234   : >> { %1936 = vmatmul.mubr.f32.vlgmr.msra.gmra.mrb[2].mxu0 %v3245_v24 }
 0x235   : >> { %2135 = vmatpush3.bf16.msra.mxu1 %v3227_v17  ;;  %2141 = vmatpush3.bf16.msra.mxu0 %v3075_v19 }
 0x236   : >> { %2136 = vmatprep.subr.bf16.mxu1 %v3515_v48  ;;  %2142 = vmatprep.subr.bf16.mxu0 %v3515_v48 }
 0x237   : >> { %2005 = vmatprep.mubr.msk.f32.mxu0 %vm2499_vm12, %v2500_v56 }
 0x239   : >> { %2138 = vmatpush3.bf16.msra.mxu1 %v3257_v60  ;;  %2144 = vmatpush3.bf16.msra.mxu0 %v3103_v13 }
 0x23a   : >> { %2145 = vmatprep.subr.bf16.mxu0 %v3515_v48  ;;  %2163 = vmatprep.subr.bf16.mxu1 %v3515_v48 }
 0x23c   : >> { %1971 = vmatmul.mubr.f32.vlgmr.msra.gmra.mrb[2].mxu1 %v961_v57 }
 0x23d   : >> { %2147 = vmatpush3.bf16.msra.mxu0 %v3125_v54  ;;  %2165 = vmatpush3.bf16.msra.mxu1 %v3059_v6 }
 0x23e   : >> { %2148 = vmatprep.subr.bf16.mxu0 %v3515_v48  ;;  %2166 = vmatprep.subr.bf16.mxu1 %v3515_v48 }
 0x23f   : >> { %2040 = vmatprep.mubr.msk.f32.mxu1 %vm2499_vm12, %v2500_v56 }
 0x241   : >> { %2150 = vmatpush3.bf16.msra.mxu0 %v3153_v21  ;;  %2168 = vmatpush3.bf16.msra.mxu1 %v3091_v55  ;;  %v1523_v21 = vld [vmem:[%s1522_s19] sm:$0x3] }
 0x242   : >> { %2151 = vmatprep.subr.bf16.mxu0 %v3515_v48  ;;  %2169 = vmatprep.subr.bf16.mxu1 %v3515_v48 }
 0x245   : >> { %2153 = vmatpush3.bf16.msra.mxu0 %v3184_v20  ;;  %2171 = vmatpush3.bf16.msra.mxu1 %v3109_v12 }
 0x246   : >> { %2154 = vmatprep.subr.bf16.mxu0 %v3515_v48  ;;  %2172 = vmatprep.subr.bf16.mxu1 %v3515_v48 }
 0x249   : >> { %2156 = vmatpush3.bf16.msra.mxu0 %v3210_v43  ;;  %2174 = vmatpush3.bf16.msra.mxu1 %v3142_v28 }
 0x24a   : >> { %2157 = vmatprep.subr.bf16.mxu0 %v3515_v48  ;;  %2175 = vmatprep.subr.bf16.mxu1 %v3515_v48 }
 0x24d   : >> { %2159 = vmatpush3.bf16.msra.mxu0 %v3234_v25  ;;  %2177 = vmatpush3.bf16.msra.mxu1 %v3175_v3 }
 0x24e   : >> { %2160 = vmatprep.subr.bf16.mxu0 %v3515_v48  ;;  %2178 = vmatprep.subr.bf16.mxu1 %v3515_v48 }
 0x251   : >> { %2162 = vmatpush3.bf16.msra.mxu0 %v3261_v5  ;;  %2180 = vmatpush3.bf16.msra.mxu1 %v3201_v22 }
 0x252   : >> { %2181 = vmatprep.subr.bf16.mxu1 %v3515_v48 }
 0x254   : >> { %2006 = vmatmul.mubr.f32.vlgmr.msra.gmra.mrb[4].mxu0 %v3238_v2 }
 0x255   : >> { %2183 = vmatpush3.bf16.msra.mxu1 %v3227_v17 }
 0x256   : >> { %2184 = vmatprep.subr.bf16.mxu1 %v3515_v48 }
 0x259   : >> { %2186 = vmatpush3.bf16.msra.mxu1 %v3257_v60 }
 0x25c   : >> { %2041 = vmatmul.mubr.f32.vlgmr.msra.gmra.mrb[4].mxu1 %v3238_v2 }
 0x2e7   : >> { %v965_v6 = vpop.f32.mrb[0].mxu0 }
 0x2e8   : >> { %v1867_v19 = vpop.f32.mrb[1].mxu0 }
 0x2ef   : >> { %v1116_v29 = vpop.f32.mrb[0].mxu1 }
 0x2f0   : >> { %v1117_v47 = vadd.f32 %v1116_v29, %v965_v6  ;;  %v1902_v55 = vpop.f32.mrb[1].mxu1 }
 0x307   : >> { %v1220_v9 = vpop.f32.mrb[2].mxu0 }
 0x308   : >> { %v1221_v13 = vadd.f32 %v1220_v9, %v1117_v47  ;;  %v1937_v50 = vpop.f32.mrb[3].mxu0 }
 0x30f   : >> { %v1309_v12 = vpop.f32.mrb[2].mxu1 }
 0x310   : >> { %v1310_v10 = vadd.f32 %v1309_v12, %v1221_v13  ;;  %v1972_v54 = vpop.f32.mrb[3].mxu1 }
 0x327   : >> { %v1428_v63 = vpop.f32.mrb[4].mxu0 }
 0x328   : >> { %v1429_v52 = vadd.f32 %v1428_v63, %v1310_v10  ;;  %v2007_v48 = vpop.f32.mrb[5].mxu0 }
 0x32f   : >> { %v1515_v28 = vpop.f32.mrb[4].mxu1 }
 0x330   : >> { %v1516_v56 = vadd.f32 %v1515_v28, %v1429_v52  ;;  %v2042_v58 = vpop.f32.mrb[5].mxu1 }
 0x332   : >> { %v1524_v42 = vadd.f32 %v1523_v21, %v1516_v56 }
 0x334   : >> { %1525 = vst [vmem:[%s1522_s19] sm:$0x3] %v1524_v42 }
 0x335 PF: >> { %s371_s9 = sadd.s32 1, %s2488_s9  }
 0x336   : >> { %p368_p7 = scmp.ge.s32.totalorder %s371_s9, 2  }
 0x337   : > { %p1526_p8 = scmp.eq.s32.totalorder (%p368_p7), %s2460_s29, 1  ;;  %p1723_p9 = scmp.ne.s32.totalorder (%p368_p7), %s2460_s29, 1 }
 0x338   : > { %370 = sbr.rel (!%p368_p7) target bundleno = 115 (0x73), region = 102 }
 0x33f   : > { %1529 = sbr.rel (%p1723_p9) target bundleno = 851 (0x353), region = 55  ;;  %v1532_v3 = vld [vmem:[#allocation2 + $0x1] ss:$2 sm:$0x3] (!%p1723_p9)  ;;  %v1545_v20 = vld [vmem:[#allocation3] sm:$0x3] (!%p1723_p9)  ;;  %v3519_v7 = vlaneseq (!%p1723_p9) }
 0x340   : > { %vm1533_vm12 = vcmp.gt.f32.partialorder (!%p1723_p9), %v1532_v3, 0.0  ;;  %v2501_v22 = vmov (!%p1723_p9), 0.0   ;;  %v1530_v18 = vld [vmem:[#allocation2] ss:$2 sm:$0x3] (!%p1723_p9) }
 0x341   : > { %v1535_v40 = vsel (!%p1723_p9), %vm1533_vm12, %v1532_v3, 1.0  ;;  %vm1542_vm6 = vcmp.lt.s32.totalorder (!%p1723_p9), %v3519_v7, 256  ;;  %v1724_v43 = vsel (!%p1723_p9), %vm1533_vm12, 1.0, %v2501_v22  ;;  %v1534_v14 = vld [vmem:[%s2645_s24] sm:$0x3] (!%p1723_p9) }
 0x342   : > { %2340 = vrcp.f32 (!%p1723_p9), %v1535_v40  ;;  %v1548_v45 = vadd.f32 (!%p1723_p9), %v1724_v43, %v1545_v20 }
 0x344   : > { %1549 = vst.msk [vmem:[#allocation3] sm:$0x3] (!%p1723_p9), %vm1542_vm6, %v1548_v45 }
 0x34c   : > { %v2341_v17 = vpop.eup %2340 }
 0x34d   : > { %v1537_v31 = vmul.f32 %v2341_v17, %v1530_v18 }
 0x34f   : > { %v1538_v32 = vsel %vm1533_vm12, %v1537_v31, 0.0 }
 0x350   : > { %v1539_v33 = vadd.f32 %v1538_v32, %v1534_v14 }
 0x352   : > { %1544 = vst.msk [vmem:[%s2645_s24] sm:$0x3] %vm1542_vm6, %v1539_v33 }
 0x353 PF: > { %p1550_p10 = scmp.eq.s32.totalorder %s2464_s30, 3 }
 0x355   : > { %p1551_p11 = pnand %p1550_p10, %p1526_p8 }
 0x356   : > { %v3520_v49 = vlaneseq (!%p1551_p11) }
 0x357   : > { %1554 = sbr.rel (%p1551_p11) target bundleno = 874 (0x36a), region = 59 }
 0x358   : > { %v1555_v34 = vld [vmem:[#allocation3] sm:$0x3] (!%p1551_p11)  ;;  %vm1564_vm8 = vcmp.lt.s32.totalorder (!%p1551_p11), %v3520_v49, 256 }
 0x359   : > { %vm1556_vm7 = vcmp.gt.f32.partialorder (!%p1551_p11), %v1555_v34, 0.0  ;;  %v1557_v36 = vld [vmem:[%s2645_s24] sm:$0x3] (!%p1551_p11) }
 0x35a   : > { %v1558_v35 = vsel (!%p1551_p11), %vm1556_vm7, %v1555_v34, 1.0 }
 0x35b   : > { %2342 = vrcp.f32 (!%p1551_p11), %v1558_v35 }
 0x365   : > { %v2343_v37 = vpop.eup %2342 }
 0x366   : > { %v1560_v38 = vmul.f32 %v2343_v37, %v1557_v36 }
 0x368   : > { %v1561_v25 = vsel %vm1556_vm7, %v1560_v38, 0.0 }
 0x369   : > { %1566 = vst.msk [vmem:[%s2645_s24] sm:$0x3] %vm1564_vm8, %v1561_v25 }
 0x36a PF: > { %s1730_s29 = sshll.u32 %s2468_s6, 5  ;;  %s1582_s8 = sshll.u32 %s2645_s24, 4  ;;  %s1583_s8 = int_to_ptr.vmem [resolvable:$true] %s1582_s8 }
 0x36b   : > { %s3372_s7 = scalar_lea.hbm %s3432_s5, %s1730_s29  ;;  %s3521_s13 = sand.u32 1, %s2452_s27  }
 0x36c   : > { %s1568_s14 = scalar_lea.sflag [#allocation8], %s3521_s13  ;;  %s2368_s15 = scalar_lea.vmem %s1583_s8, 32 }
 0x36d   : > { %p2369_p12 = scmp.ne.s32.totalorder %s1583_s8, %s2368_s15  ;;  %s2502_s21 = smov [#allocation7]  }
 0x36e   : > { %s2372_s22 = sshll.u32 %s2502_s21, 4  ;;  %s2373_s22 = int_to_ptr.vmem [resolvable:$false] %s2372_s22 }
 0x36f   : > { %p2370_p13 = pnand %p2369_p12, %p2601_p2  ;;  %s2374_s23 = scalar_lea.vmem %s2373_s22, 64 }
 0x370   : > { %p2375_p1 = scmp.lt.s32.totalorder %s1583_s8, %s2373_s22  ;;  %p2376_p3 = scmp.lt.s32.totalorder %s2374_s23, %s2368_s15 }
 0x371   : > { %p2371_p0 = pneg %p2370_p13 }
 0x372   : > { %p2377_p5 = por %p2376_p3, %p2375_p1 }
 0x374   : > { %p2378_p6 = pnand %p2377_p5, %p2371_p0 }
 0x376   : > { %2381 = shalt.err (!%p2378_p6)
}
 0x377   : > { %s2382_s6 = scalar_lea.hbm %s3372_s7, 32  ;;  %s2386_s26 = scalar_lea.hbm %s3432_s5, 64 }
 0x378   : > { %p2383_p7 = scmp.ne.s32.totalorder %s3372_s7, %s2382_s6  ;;  %p2387_p10 = scmp.lt.u32.totalorder %s3372_s7, %s3432_s5 }
 0x379   : > { %p2388_p11 = scmp.lt.u32.totalorder %s2386_s26, %s2382_s6  ;;  %p2390_p13 = scmp.lt.u32.totalorder %s2382_s6, %s3372_s7 }
 0x37a   : > { %p2384_p8 = pnand %p2383_p7, %p2601_p2 }
 0x37b   : > { %p2389_p12 = por %p2388_p11, %p2387_p10 }
 0x37c   : > { %p2385_p9 = pneg %p2384_p8 }
 0x37d   : > { %p2391_p0 = por %p2390_p13, %p2389_p12 }
 0x37f   : > { %p2392_p1 = pnand %p2391_p0, %p2385_p9 }
 0x381   : > { %2395 = shalt.err (!%p2392_p1)
}
 0x382   : > { %2187 = dma.vmem_to_hbm [thread:$0]  (%p2601_p2), %s1583_s8, 32, %s3372_s7, %s1568_s14  }
 0x383 PF: > { %p2193_p3 = scmp.ge.s32.totalorder %s2484_s10, 2  ;;  %s1594_s12 = sand.u32 1, %s2448_s1  }
 0x384   : > { %s1595_s18 = scalar_lea.sflag [#allocation8], %s1594_s12 }
 0x385   : > { %p2190_p5 = pnand %p2193_p3, %p2609_p4 }
 0x387   : > { %2443 = dma.done.wait (!%p2190_p5), %s1595_s18, 32  }
 0x388   : > { %2445 = vsyncadd (!%p2190_p5), %s1595_s18, 4294967264  ;;  %s28_s10 = sadd.s32 1, %s2484_s10   ;;  %s3522_s29 = sld [smem:[#allocation11_spill]] }
 0x389   : > { %p25_p6 = scmp.ge.s32.totalorder %s28_s10, 18   ;;  %s3523_s30 = sld [smem:[#allocation12_spill]] }
 0x38a   : > { %s3524_s6 = sld [smem:[#allocation13_spill]]  ;;  %s3525_s7 = sld [smem:[#allocation14_spill]] }
 0x38b   : > { %s3526_s8 = sld [smem:[#allocation15_spill]]  ;;  %s3527_s9 = sld [smem:[#allocation16_spill]] }
 0x38c   : > { %s3528_s1 = smov %s2452_s27  ;;  %s3529_s27 = smov %s2456_s28 }
 0x38d   : > { %s3530_s28 = smov %s2620_s20  ;;  %27 = sbr.rel (!%p25_p6) target bundleno = 31 (0x1f), region = 113 }
 0x394   :  { %1600 = vsyncpa [#allocation8], 1 }
 0x395   :  { %1602 = vsyncpa [#allocation8 + $0x1], 1 }

</bundles_post_ra>
